<compile_context>
chip_gen: v5e
topology: v5e:2x2
jax: 0.10.0
libtpu: 0.0.40
codegen_flags: <defaults>
</compile_context>

<pallas_src>
import jax
import jax.numpy as jnp
import numpy as np
from jax import lax
from jax.experimental import pallas as pl
from jax.experimental.pallas import tpu as pltpu

# ---- small, deterministic hyper-parameters consistent with the module ------
D_MODEL = 32                       # input_dim (channel dim C)
D_INNER = 2 * D_MODEL              # 64
D_STATE = 16                       # ssm state size
D_CONV = 3                         # depthwise conv kernel
DT_RANK = max(1, -(-D_MODEL // 16))  # "auto" = ceil(d_model / 16) = 2
EPS = 1e-5

B = 2
H = W = Dp = 4
SEQ_LEN = H * W * Dp               # 64
BL = B * SEQ_LEN                   # 128 rows for the front-end matmul
LANES = B * D_INNER                # 128 lane-folded inner width
XDBL_W = LANES + 2 * B * D_STATE   # 192 = [delta(128) | B(32) | C(32)]
CHUNK = 8
N_CHUNKS = SEQ_LEN // CHUNK        # 8


def _sigmoid(x):
    return 1.0 / (1.0 + jnp.exp(-x))


def _softplus(x):
    # thresholded like torch.nn.functional.softplus; for very negative x
    # return exp(x) (== log1p(exp(x)) to f32 precision) instead of 0.
    xc = jnp.minimum(x, 20.0)
    e = jnp.exp(xc)
    return jnp.where(x > 20.0, x, jnp.where(x < -15.0, e, jnp.log(1.0 + e)))


# ---------------------------- Pallas kernel ---------------------------------
def mamba_residual_kernel(
    x_ref, in_proj_ref, conv_w_ref, conv_b_ref, xproj_ref, dt_b_ref,
    a_ref, d_par_ref, out_proj_ref,
    o_ref,
    xdbl_s, xsc_s, res_s, y_s,
):
    L = SEQ_LEN

    # ---- RMSNorm + in_proj on (B*L, C) rows: 128 MXU rows -------------------
    x = x_ref[...]                                            # (128, 32)
    ms = jnp.mean(x * x, axis=-1, keepdims=True)
    xn = x * lax.rsqrt(ms + EPS)                              # norm scale folded into W
    xz = jnp.dot(xn, in_proj_ref[...],
                 preferred_element_type=jnp.float32)          # (128, 128)

    # ---- single batch->lane fold: rows(b*L) -> lanes [b0 | b1] --------------
    xs_f = jnp.concatenate([xz[:L, :D_INNER], xz[L:, :D_INNER]], axis=1)   # (64,128)
    res_f = jnp.concatenate([xz[:L, D_INNER:], xz[L:, D_INNER:]], axis=1)  # (64,128)
    res_s[...] = res_f                                        # park until the back-end

    # ---- depthwise causal conv along time (sublanes) + SiLU, lane-dense -----
    # batch lives in lanes, so the time shift cannot leak across samples.
    row_l = lax.broadcasted_iota(jnp.int32, (L, LANES), 0)
    conv_w = conv_w_ref[...]                                  # (3, 128) lane-folded
    acc = conv_b_ref[...] + xs_f * conv_w[D_CONV - 1:D_CONV, :]
    for k in range(D_CONV - 1):
        shift = D_CONV - 1 - k
        shifted = jnp.where(row_l >= shift, jnp.roll(xs_f, shift, axis=0), 0.0)
        acc = acc + shifted * conv_w[k:k + 1, :]
    xs_c = acc * _sigmoid(acc)                                # (64, 128)
    xsc_s[...] = xs_c

    # ---- fused x_proj(+dt_proj), block-diagonal over the folded batch -------
    # columns: [delta_b0|delta_b1 (128) | B_b0|B_b1 (32) | C_b0|C_b1 (32)]
    xdbl_s[...] = jnp.dot(xs_c, xproj_ref[...],
                          preferred_element_type=jnp.float32)  # (64, 192)

    a_mat = a_ref[...]                                        # (16, 128)  A = -exp(A_log)
    dt_b = dt_b_ref[...]                                      # (1, 128)

    # ---- chunked discretization + selective scan ----------------------------
    # Per 8-step chunk: softplus + exp(dA) + B/C broadcast built in vregs, then
    # the recurrence runs immediately; y stored as one aligned (8,128) block.
    def chunk_body(ci, s):
        base = pl.multiple_of(ci * CHUNK, CHUNK)
        xdbl_c = xdbl_s[pl.ds(base, CHUNK), :]                # (8, 192)
        xsc_c = xsc_s[pl.ds(base, CHUNK), :]                  # (8, 128)

        delta_c = _softplus(xdbl_c[:, :LANES] + dt_b)         # (8, 128)
        du_c = delta_c * xsc_c                                # (8, 128)
        da_c = jnp.exp(delta_c[:, None, :] * a_mat[None, :, :])   # (8, 16, 128)

        b0 = xdbl_c[:, LANES:LANES + D_STATE]                 # (8, 16)
        b1 = xdbl_c[:, LANES + D_STATE:LANES + 2 * D_STATE]
        c0 = xdbl_c[:, LANES + 2 * D_STATE:LANES + 3 * D_STATE]
        c1 = xdbl_c[:, LANES + 3 * D_STATE:]
        b_bc = jnp.concatenate(
            [jnp.broadcast_to(b0[:, :, None], (CHUNK, D_STATE, D_INNER)),
             jnp.broadcast_to(b1[:, :, None], (CHUNK, D_STATE, D_INNER))],
            axis=2)                                           # (8, 16, 128)
        c_bc = jnp.concatenate(
            [jnp.broadcast_to(c0[:, :, None], (CHUNK, D_STATE, D_INNER)),
             jnp.broadcast_to(c1[:, :, None], (CHUNK, D_STATE, D_INNER))],
            axis=2)                                           # (8, 16, 128)

        ys = []
        for t in range(CHUNK):                                # unrolled recurrence
            s = da_c[t] * s + du_c[t:t + 1, :] * b_bc[t]      # (16, 128)
            ys.append(jnp.sum(s * c_bc[t], axis=0, keepdims=True))   # (1, 128)
        y_s[pl.ds(base, CHUNK), :] = jnp.concatenate(ys, axis=0)     # one (8,128) store
        return s

    lax.fori_loop(0, N_CHUNKS, chunk_body,
                  jnp.zeros((D_STATE, LANES), jnp.float32))

    # ---- skip term, gate, block-diag out_proj, residual ----------------------
    y = y_s[...] + xsc_s[...] * d_par_ref[...]                # (64, 128)
    res = res_s[...]
    y = y * (res * _sigmoid(res))
    out = jnp.dot(y, out_proj_ref[...],
                  preferred_element_type=jnp.float32)         # (64, 64) = [b0_C | b1_C]
    x_f = jnp.concatenate([x_ref[pl.ds(0, L), :], x_ref[pl.ds(L, L), :]], axis=1)
    o_ref[...] = (out + x_f).astype(o_ref.dtype)


# ------------------------------ wrapper --------------------------------------
def _fuse_params(params):
    """Algebraic parameter fusions done outside the kernel."""
    # RMSNorm scale folded into in_proj weight.
    in_proj_f = params["norm_w"].reshape(D_MODEL, 1) * params["in_proj_w"]   # (32,128)
    # dt_proj folded into x_proj, then made block-diagonal over the folded batch.
    w_delta = params["x_proj_w"][:, :DT_RANK] @ params["dt_proj_w"]          # (64,64)
    w_B = params["x_proj_w"][:, DT_RANK:DT_RANK + D_STATE]                   # (64,16)
    w_C = params["x_proj_w"][:, DT_RANK + D_STATE:]                          # (64,16)
    zdd = jnp.zeros((D_INNER, D_INNER), jnp.float32)
    zds = jnp.zeros((D_INNER, D_STATE), jnp.float32)
    xproj_bd = jnp.concatenate([
        jnp.concatenate([w_delta, zdd, w_B, zds, w_C, zds], axis=1),
        jnp.concatenate([zdd, w_delta, zds, w_B, zds, w_C], axis=1)],
        axis=0)                                                              # (128,192)
    # per-channel params tiled into the folded (B*D_INNER) lane layout
    a_fold = jnp.tile(-jnp.exp(params["A_log_t"]), (1, B))                   # (16,128)
    conv_w_f = jnp.tile(params["conv_w"], (1, B))                            # (3,128)
    conv_b_f = jnp.tile(params["conv_b"], (1, B))                            # (1,128)
    dt_b_f = jnp.tile(params["dt_proj_b"], (1, B))                           # (1,128)
    d_f = jnp.tile(params["D_param"], (1, B))                                # (1,128)
    # block-diagonal out_proj for the folded layout
    zoc = jnp.zeros((D_INNER, D_MODEL), jnp.float32)
    out_bd = jnp.concatenate([
        jnp.concatenate([params["out_proj_w"], zoc], axis=1),
        jnp.concatenate([zoc, params["out_proj_w"]], axis=1)], axis=0)       # (128,64)
    return (in_proj_f, conv_w_f, conv_b_f, xproj_bd, dt_b_f, a_fold, d_f, out_bd)


def intra_sample_attention_forward(feature, params, *, training=True):
    """feature: (b, c, h, w, d) float32 (PyTorch NCDHW convention)."""
    if not training:
        return feature
    b, c, h, w, d = feature.shape
    L = h * w * d
    assert b == B and L == SEQ_LEN and c == D_MODEL

    # (b, c, h, w, d) -> (b*L, c) rows, row index = b*L + l
    x = jnp.transpose(feature, (0, 2, 3, 4, 1)).reshape(b * L, c)
    fused = _fuse_params(params)
    in_arrays = (x,) + fused

    def full(shape):
        return pl.BlockSpec(shape, lambda i, _n=len(shape): (0,) * _n)

    out_f = pl.pallas_call(
        mamba_residual_kernel,
        out_shape=jax.ShapeDtypeStruct((L, b * c), jnp.float32),
        grid_spec=pltpu.PrefetchScalarGridSpec(
            num_scalar_prefetch=0,
            grid=(1,),                       # both samples folded into the lanes
            in_specs=[full(a.shape) for a in in_arrays],
            out_specs=full((L, b * c)),
            scratch_shapes=[
                pltpu.VMEM((L, XDBL_W), jnp.float32),   # xdbl  (64,192)  48 KiB
                pltpu.VMEM((L, LANES), jnp.float32),    # xs_c  (64,128)  32 KiB
                pltpu.VMEM((L, LANES), jnp.float32),    # res   (64,128)  32 KiB
                pltpu.VMEM((L, LANES), jnp.float32),    # y     (64,128)  32 KiB
            ],
        ),
        compiler_params=pltpu.CompilerParams(
            dimension_semantics=("arbitrary",)),
    )(*in_arrays)

    # lane-folded (L, B*C) -> (b, c, h, w, d)   (free layout plumbing in XLA)
    out = jnp.stack([out_f[:, :c], out_f[:, c:]], axis=0)      # (2, L, C)
    out = out.reshape(b, h, w, d, c)
    return jnp.transpose(out, (0, 4, 1, 2, 3))


# ----------------------- deterministic parameter init ------------------------
def init_params(key):
    ks = jax.random.split(key, 7)
    s = 0.1
    A = jnp.tile(jnp.arange(1, D_STATE + 1, dtype=jnp.float32)[:, None],
                 (1, D_INNER))                                 # mamba-standard A init
    return dict(
        norm_w=jnp.ones((1, D_MODEL), jnp.float32),
        in_proj_w=s * jax.random.normal(ks[0], (D_MODEL, 2 * D_INNER), jnp.float32),
        conv_w=s * jax.random.normal(ks[1], (D_CONV, D_INNER), jnp.float32),
        conv_b=s * jax.random.normal(ks[2], (1, D_INNER), jnp.float32),
        x_proj_w=s * jax.random.normal(ks[3], (D_INNER, DT_RANK + 2 * D_STATE), jnp.float32),
        dt_proj_w=s * jax.random.normal(ks[4], (DT_RANK, D_INNER), jnp.float32),
        dt_proj_b=s * jax.random.normal(ks[5], (1, D_INNER), jnp.float32),
        A_log_t=jnp.log(A),                                    # stored as (D_STATE, D_INNER)
        D_param=jnp.ones((1, D_INNER), jnp.float32),
        out_proj_w=s * jax.random.normal(ks[6], (D_INNER, D_MODEL), jnp.float32),
    )


# ------------------------ pure-JAX reference (checking) ----------------------
def mamba_ref_single(x, p):
    ms = jnp.mean(x * x, axis=-1, keepdims=True)
    xn = x * lax.rsqrt(ms + EPS) * p["norm_w"]
    xz = xn @ p["in_proj_w"]
    xs, res = xz[:, :D_INNER], xz[:, D_INNER:]
    conv = jnp.zeros_like(xs) + p["conv_b"]
    for k in range(D_CONV):
        shift = D_CONV - 1 - k
        shifted = jnp.pad(xs, ((shift, 0), (0, 0)))[:SEQ_LEN]
        conv = conv + shifted * p["conv_w"][k][None, :]
    xs_c = conv * _sigmoid(conv)
    xdbl = xs_c @ p["x_proj_w"]
    dr = xdbl[:, :DT_RANK]
    Bm = xdbl[:, DT_RANK:DT_RANK + D_STATE]
    Cm = xdbl[:, DT_RANK + D_STATE:]
    delta = _softplus(dr @ p["dt_proj_w"] + p["dt_proj_b"])
    A_t = -jnp.exp(p["A_log_t"])
    dA = jnp.exp(delta[:, None, :] * A_t[None, :, :])
    dBu = (delta * xs_c)[:, None, :] * Bm[:, :, None]

    def step(s, inp):
        a, b_ = inp
        s = a * s + b_
        return s, s

    _, states = lax.scan(step, jnp.zeros((D_STATE, D_INNER), jnp.float32), (dA, dBu))
    y = jnp.sum(states * Cm[:, :, None], axis=1)
    y = y + xs_c * p["D_param"]
    y = y * (res * _sigmoid(res))
    return y @ p["out_proj_w"] + x


if __name__ == "__main__":
    key = jax.random.PRNGKey(0)
    pkey, xkey = jax.random.split(key)
    params = init_params(pkey)
    feature = jax.random.normal(xkey, (B, D_MODEL, H, W, Dp), jnp.float32)

    out = intra_sample_attention_forward(feature, params, training=True)
    out = jax.block_until_ready(out)
    assert out.shape == feature.shape

    # reference check (unfused parameters / unfolded batch)
    x_seq = jnp.transpose(feature, (0, 2, 3, 4, 1)).reshape(B, SEQ_LEN, D_MODEL)
    ref_seq = jax.vmap(lambda xx: mamba_ref_single(xx, params))(x_seq)
    ref = jnp.transpose(ref_seq.reshape(B, H, W, Dp, D_MODEL), (0, 4, 1, 2, 3))
    np.testing.assert_allclose(np.asarray(out), np.asarray(ref),
                               rtol=2e-4, atol=2e-4)
    print("KERNEL_OK")
</pallas_src>

<mosaic_0001>
module attributes {stable_mosaic.version = 11 : i64} {
  func.func @mamba_residual_kernel(%arg0: i32, %arg1: memref<128x32xf32, #tpu.memory_space<vmem>>, %arg2: memref<32x128xf32, #tpu.memory_space<vmem>>, %arg3: memref<3x128xf32, #tpu.memory_space<vmem>>, %arg4: memref<1x128xf32, #tpu.memory_space<vmem>>, %arg5: memref<128x192xf32, #tpu.memory_space<vmem>>, %arg6: memref<1x128xf32, #tpu.memory_space<vmem>>, %arg7: memref<16x128xf32, #tpu.memory_space<vmem>>, %arg8: memref<1x128xf32, #tpu.memory_space<vmem>>, %arg9: memref<128x64xf32, #tpu.memory_space<vmem>>, %arg10: memref<64x64xf32, #tpu.memory_space<vmem>>, %arg11: memref<64x192xf32, #tpu.memory_space<vmem>>, %arg12: memref<64x128xf32, #tpu.memory_space<vmem>>, %arg13: memref<64x128xf32, #tpu.memory_space<vmem>>, %arg14: memref<64x128xf32, #tpu.memory_space<vmem>>) attributes {dimension_semantics = [#tpu.dimension_semantics<arbitrary>], iteration_bounds = array<i64: 1>, scalar_prefetch = 0 : i64, scratch_operands = 4 : i64, tpu.core_type = #tpu.core_type<tc>, window_params = [{pipeline_mode = #tpu.pipeline_mode<synchronous>, transform_indices = @transform_0, window_bounds = array<i64: 128, 32>}, {pipeline_mode = #tpu.pipeline_mode<synchronous>, transform_indices = @transform_1, window_bounds = array<i64: 32, 128>}, {pipeline_mode = #tpu.pipeline_mode<synchronous>, transform_indices = @transform_2, window_bounds = array<i64: 3, 128>}, {pipeline_mode = #tpu.pipeline_mode<synchronous>, transform_indices = @transform_3, window_bounds = array<i64: 1, 128>}, {pipeline_mode = #tpu.pipeline_mode<synchronous>, transform_indices = @transform_4, window_bounds = array<i64: 128, 192>}, {pipeline_mode = #tpu.pipeline_mode<synchronous>, transform_indices = @transform_5, window_bounds = array<i64: 1, 128>}, {pipeline_mode = #tpu.pipeline_mode<synchronous>, transform_indices = @transform_6, window_bounds = array<i64: 16, 128>}, {pipeline_mode = #tpu.pipeline_mode<synchronous>, transform_indices = @transform_7, window_bounds = array<i64: 1, 128>}, {pipeline_mode = #tpu.pipeline_mode<synchronous>, transform_indices = @transform_8, window_bounds = array<i64: 128, 64>}, {pipeline_mode = #tpu.pipeline_mode<synchronous>, transform_indices = @transform_9, window_bounds = array<i64: 64, 64>}]} {
    %c0 = arith.constant 0 : index
    %c0_0 = arith.constant 0 : index
    %0 = vector.load %arg1[%c0, %c0_0] : memref<128x32xf32, #tpu.memory_space<vmem>>, vector<128x32xf32>
    %1 = arith.mulf %0, %0 : vector<128x32xf32>
    %cst = arith.constant dense<0.000000e+00> : vector<128xf32>
    %2 = vector.multi_reduction <add>, %1, %cst [1] : vector<128x32xf32> to vector<128xf32>
    %3 = vector.shape_cast %2 : vector<128xf32> to vector<128x1xf32>
    %cst_1 = arith.constant 3.200000e+01 : f32
    %4 = vector.broadcast %cst_1 : f32 to vector<128x1xf32>
    %5 = arith.divf %3, %4 : vector<128x1xf32>
    %cst_2 = arith.constant 9.99999974E-6 : f32
    %6 = vector.broadcast %cst_2 : f32 to vector<128x1xf32>
    %7 = arith.addf %5, %6 : vector<128x1xf32>
    %8 = math.rsqrt %7 : vector<128x1xf32>
    %9 = vector.broadcast %8 : vector<128x1xf32> to vector<128x32xf32>
    %10 = arith.mulf %0, %9 : vector<128x32xf32>
    %c0_3 = arith.constant 0 : index
    %c0_4 = arith.constant 0 : index
    %11 = vector.load %arg2[%c0_3, %c0_4] : memref<32x128xf32, #tpu.memory_space<vmem>>, vector<32x128xf32>
    %cst_5 = arith.constant dense<0.000000e+00> : vector<128x128xf32>
    %12 = tpu.matmul %10, %11, %cst_5 {dimension_numbers = #tpu.dot_dimension_numbers<[1], [0], [0], [1], [0, 0, 1, 1], [], []>} : vector<128x32xf32>, vector<32x128xf32>, vector<128x128xf32> -> vector<128x128xf32>
    %13 = vector.extract_strided_slice %12 {offsets = [0, 0], sizes = [64, 64], strides = [1, 1]} : vector<128x128xf32> to vector<64x64xf32>
    %14 = vector.extract_strided_slice %12 {offsets = [64, 0], sizes = [64, 64], strides = [1, 1]} : vector<128x128xf32> to vector<64x64xf32>
    %15 = tpu.concatenate %13, %14 in 1 : vector<64x64xf32>, vector<64x64xf32> -> vector<64x128xf32>
    %16 = vector.extract_strided_slice %12 {offsets = [0, 64], sizes = [64, 64], strides = [1, 1]} : vector<128x128xf32> to vector<64x64xf32>
    %17 = vector.extract_strided_slice %12 {offsets = [64, 64], sizes = [64, 64], strides = [1, 1]} : vector<128x128xf32> to vector<64x64xf32>
    %18 = tpu.concatenate %16, %17 in 1 : vector<64x64xf32>, vector<64x64xf32> -> vector<64x128xf32>
    %c0_6 = arith.constant 0 : index
    %c0_7 = arith.constant 0 : index
    %19 = vector.load %arg13[%c0_6, %c0_7] : memref<64x128xf32, #tpu.memory_space<vmem>>, vector<64x128xf32>
    tpu.vector_store %arg13[%c0_6, %c0_7], %18 {strides = array<i32>} : memref<64x128xf32, #tpu.memory_space<vmem>>, vector<64x128xf32>,
    %20 = tpu.iota {dimensions = array<i32: 0>} : vector<64x128xi32>
    %c0_8 = arith.constant 0 : index
    %c0_9 = arith.constant 0 : index
    %21 = vector.load %arg3[%c0_8, %c0_9] : memref<3x128xf32, #tpu.memory_space<vmem>>, vector<3x128xf32>
    %c0_10 = arith.constant 0 : index
    %c0_11 = arith.constant 0 : index
    %22 = vector.load %arg4[%c0_10, %c0_11] : memref<1x128xf32, #tpu.memory_space<vmem>>, vector<1x128xf32>
    %23 = vector.extract_strided_slice %21 {offsets = [2, 0], sizes = [1, 128], strides = [1, 1]} : vector<3x128xf32> to vector<1x128xf32>
    %24 = vector.broadcast %23 : vector<1x128xf32> to vector<64x128xf32>
    %25 = arith.mulf %15, %24 : vector<64x128xf32>
    %26 = vector.broadcast %22 : vector<1x128xf32> to vector<64x128xf32>
    %27 = arith.addf %26, %25 : vector<64x128xf32>
    %c2_i32 = arith.constant 2 : i32
    %28 = vector.broadcast %c2_i32 : i32 to vector<64x128xi32>
    %29 = arith.cmpi sge, %20, %28 : vector<64x128xi32>
    %30 = vector.extract_strided_slice %15 {offsets = [62, 0], sizes = [2, 128], strides = [1, 1]} : vector<64x128xf32> to vector<2x128xf32>
    %31 = vector.extract_strided_slice %15 {offsets = [0, 0], sizes = [62, 128], strides = [1, 1]} : vector<64x128xf32> to vector<62x128xf32>
    %32 = tpu.concatenate %30, %31 in 0 : vector<2x128xf32>, vector<62x128xf32> -> vector<64x128xf32>
    %cst_12 = arith.constant 0.000000e+00 : f32
    %33 = vector.broadcast %cst_12 : f32 to vector<64x128xf32>
    %34 = arith.select %29, %32, %33 : vector<64x128xi1>, vector<64x128xf32>
    %35 = vector.extract_strided_slice %21 {offsets = [0, 0], sizes = [1, 128], strides = [1, 1]} : vector<3x128xf32> to vector<1x128xf32>
    %36 = vector.broadcast %35 : vector<1x128xf32> to vector<64x128xf32>
    %37 = arith.mulf %34, %36 : vector<64x128xf32>
    %38 = arith.addf %27, %37 : vector<64x128xf32>
    %c1_i32 = arith.constant 1 : i32
    %39 = vector.broadcast %c1_i32 : i32 to vector<64x128xi32>
    %40 = arith.cmpi sge, %20, %39 : vector<64x128xi32>
    %41 = vector.extract_strided_slice %15 {offsets = [63, 0], sizes = [1, 128], strides = [1, 1]} : vector<64x128xf32> to vector<1x128xf32>
    %42 = vector.extract_strided_slice %15 {offsets = [0, 0], sizes = [63, 128], strides = [1, 1]} : vector<64x128xf32> to vector<63x128xf32>
    %43 = tpu.concatenate %41, %42 in 0 : vector<1x128xf32>, vector<63x128xf32> -> vector<64x128xf32>
    %cst_13 = arith.constant 0.000000e+00 : f32
    %44 = vector.broadcast %cst_13 : f32 to vector<64x128xf32>
    %45 = arith.select %40, %43, %44 : vector<64x128xi1>, vector<64x128xf32>
    %46 = vector.extract_strided_slice %21 {offsets = [1, 0], sizes = [1, 128], strides = [1, 1]} : vector<3x128xf32> to vector<1x128xf32>
    %47 = vector.broadcast %46 : vector<1x128xf32> to vector<64x128xf32>
    %48 = arith.mulf %45, %47 : vector<64x128xf32>
    %49 = arith.addf %38, %48 : vector<64x128xf32>
    %cst_14 = arith.constant 0.000000e+00 : f32
    %50 = vector.broadcast %cst_14 : f32 to vector<64x128xf32>
    %51 = arith.subf %50, %49 : vector<64x128xf32>
    %52 = math.exp %51 : vector<64x128xf32>
    %cst_15 = arith.constant 1.000000e+00 : f32
    %53 = vector.broadcast %cst_15 : f32 to vector<64x128xf32>
    %54 = arith.addf %53, %52 : vector<64x128xf32>
    %cst_16 = arith.constant 1.000000e+00 : f32
    %55 = vector.broadcast %cst_16 : f32 to vector<64x128xf32>
    %56 = arith.divf %55, %54 : vector<64x128xf32>
    %57 = arith.mulf %49, %56 : vector<64x128xf32>
    %c0_17 = arith.constant 0 : index
    %c0_18 = arith.constant 0 : index
    %58 = vector.load %arg12[%c0_17, %c0_18] : memref<64x128xf32, #tpu.memory_space<vmem>>, vector<64x128xf32>
    tpu.vector_store %arg12[%c0_17, %c0_18], %57 {strides = array<i32>} : memref<64x128xf32, #tpu.memory_space<vmem>>, vector<64x128xf32>,
    %c0_19 = arith.constant 0 : index
    %c0_20 = arith.constant 0 : index
    %59 = vector.load %arg5[%c0_19, %c0_20] : memref<128x192xf32, #tpu.memory_space<vmem>>, vector<128x192xf32>
    %cst_21 = arith.constant dense<0.000000e+00> : vector<64x192xf32>
    %60 = tpu.matmul %57, %59, %cst_21 {dimension_numbers = #tpu.dot_dimension_numbers<[1], [0], [0], [1], [0, 0, 1, 1], [], []>} : vector<64x128xf32>, vector<128x192xf32>, vector<64x192xf32> -> vector<64x192xf32>
    %c0_22 = arith.constant 0 : index
    %c0_23 = arith.constant 0 : index
    %61 = vector.load %arg11[%c0_22, %c0_23] : memref<64x192xf32, #tpu.memory_space<vmem>>, vector<64x192xf32>
    tpu.vector_store %arg11[%c0_22, %c0_23], %60 {strides = array<i32>} : memref<64x192xf32, #tpu.memory_space<vmem>>, vector<64x192xf32>,
    %c0_24 = arith.constant 0 : index
    %c0_25 = arith.constant 0 : index
    %62 = vector.load %arg7[%c0_24, %c0_25] : memref<16x128xf32, #tpu.memory_space<vmem>>, vector<16x128xf32>
    %c0_26 = arith.constant 0 : index
    %c0_27 = arith.constant 0 : index
    %63 = vector.load %arg6[%c0_26, %c0_27] : memref<1x128xf32, #tpu.memory_space<vmem>>, vector<1x128xf32>
    %cst_28 = arith.constant 0.000000e+00 : f32
    %64 = vector.broadcast %cst_28 : f32 to vector<16x128xf32>
    %c0_i32 = arith.constant 0 : i32
    %c8_i32 = arith.constant 8 : i32
    %65 = arith.addi %c0_i32, %c8_i32 : i32
    %c1_i32_29 = arith.constant 1 : i32
    %66 = scf.for %arg15 = %c0_i32 to %65 step %c1_i32_29 iter_args(%arg16 = %64) -> (vector<16x128xf32>)  : i32 {
      %c8_i32_50 = arith.constant 8 : i32
      %90 = arith.muli %arg15, %c8_i32_50 : i32
      %91 = tpu.assume_multiple %90, 8 : i32
      %92 = arith.index_cast %91 : i32 to index
      %c0_51 = arith.constant 0 : index
      %93 = vector.load %arg11[%92, %c0_51] : memref<64x192xf32, #tpu.memory_space<vmem>>, vector<8x192xf32>
      %94 = arith.index_cast %91 : i32 to index
      %c0_52 = arith.constant 0 : index
      %95 = vector.load %arg12[%94, %c0_52] : memref<64x128xf32, #tpu.memory_space<vmem>>, vector<8x128xf32>
      %96 = vector.extract_strided_slice %93 {offsets = [0, 0], sizes = [8, 128], strides = [1, 1]} : vector<8x192xf32> to vector<8x128xf32>
      %97 = vector.broadcast %63 : vector<1x128xf32> to vector<8x128xf32>
      %98 = arith.addf %96, %97 : vector<8x128xf32>
      %cst_53 = arith.constant 2.000000e+01 : f32
      %99 = vector.broadcast %cst_53 : f32 to vector<8x128xf32>
      %100 = arith.minimumf %98, %99 : vector<8x128xf32>
      %101 = math.exp %100 : vector<8x128xf32>
      %cst_54 = arith.constant 2.000000e+01 : f32
      %102 = vector.broadcast %cst_54 : f32 to vector<8x128xf32>
      %103 = arith.cmpf ogt, %98, %102 : vector<8x128xf32>
      %cst_55 = arith.constant -1.500000e+01 : f32
      %104 = vector.broadcast %cst_55 : f32 to vector<8x128xf32>
      %105 = arith.cmpf olt, %98, %104 : vector<8x128xf32>
      %cst_56 = arith.constant 1.000000e+00 : f32
      %106 = vector.broadcast %cst_56 : f32 to vector<8x128xf32>
      %107 = arith.addf %106, %101 : vector<8x128xf32>
      %108 = math.log %107 : vector<8x128xf32>
      %109 = arith.select %105, %101, %108 : vector<8x128xi1>, vector<8x128xf32>
      %110 = arith.select %103, %98, %109 : vector<8x128xi1>, vector<8x128xf32>
      %111 = arith.mulf %110, %95 : vector<8x128xf32>
      %112 = vector.shape_cast %110 : vector<8x128xf32> to vector<8x1x128xf32>
      %113 = vector.shape_cast %62 : vector<16x128xf32> to vector<1x16x128xf32>
      %114 = vector.broadcast %112 : vector<8x1x128xf32> to vector<8x16x128xf32>
      %115 = vector.broadcast %113 : vector<1x16x128xf32> to vector<8x16x128xf32>
      %116 = arith.mulf %114, %115 : vector<8x16x128xf32>
      %117 = math.exp %116 : vector<8x16x128xf32>
      %118 = vector.extract_strided_slice %93 {offsets = [0, 128], sizes = [8, 16], strides = [1, 1]} : vector<8x192xf32> to vector<8x16xf32>
      %119 = vector.extract_strided_slice %93 {offsets = [0, 144], sizes = [8, 16], strides = [1, 1]} : vector<8x192xf32> to vector<8x16xf32>
      %120 = vector.extract_strided_slice %93 {offsets = [0, 160], sizes = [8, 16], strides = [1, 1]} : vector<8x192xf32> to vector<8x16xf32>
      %121 = vector.extract_strided_slice %93 {offsets = [0, 176], sizes = [8, 16], strides = [1, 1]} : vector<8x192xf32> to vector<8x16xf32>
      %122 = vector.shape_cast %118 : vector<8x16xf32> to vector<8x16x1xf32>
      %123 = vector.shape_cast %122 : vector<8x16x1xf32> to vector<8x16x1xf32>
      %124 = vector.broadcast %123 : vector<8x16x1xf32> to vector<8x16x64xf32>
      %125 = vector.shape_cast %119 : vector<8x16xf32> to vector<8x16x1xf32>
      %126 = vector.shape_cast %125 : vector<8x16x1xf32> to vector<8x16x1xf32>
      %127 = vector.broadcast %126 : vector<8x16x1xf32> to vector<8x16x64xf32>
      %128 = tpu.concatenate %124, %127 in 2 : vector<8x16x64xf32>, vector<8x16x64xf32> -> vector<8x16x128xf32>
      %129 = vector.shape_cast %120 : vector<8x16xf32> to vector<8x16x1xf32>
      %130 = vector.shape_cast %129 : vector<8x16x1xf32> to vector<8x16x1xf32>
      %131 = vector.broadcast %130 : vector<8x16x1xf32> to vector<8x16x64xf32>
      %132 = vector.shape_cast %121 : vector<8x16xf32> to vector<8x16x1xf32>
      %133 = vector.shape_cast %132 : vector<8x16x1xf32> to vector<8x16x1xf32>
      %134 = vector.broadcast %133 : vector<8x16x1xf32> to vector<8x16x64xf32>
      %135 = tpu.concatenate %131, %134 in 2 : vector<8x16x64xf32>, vector<8x16x64xf32> -> vector<8x16x128xf32>
      %136 = vector.extract_strided_slice %117 {offsets = [0, 0, 0], sizes = [1, 16, 128], strides = [1, 1, 1]} : vector<8x16x128xf32> to vector<1x16x128xf32>
      %137 = vector.shape_cast %136 : vector<1x16x128xf32> to vector<16x128xf32>
      %138 = arith.mulf %137, %arg16 : vector<16x128xf32>
      %139 = vector.extract_strided_slice %111 {offsets = [0, 0], sizes = [1, 128], strides = [1, 1]} : vector<8x128xf32> to vector<1x128xf32>
      %140 = vector.extract_strided_slice %128 {offsets = [0, 0, 0], sizes = [1, 16, 128], strides = [1, 1, 1]} : vector<8x16x128xf32> to vector<1x16x128xf32>
      %141 = vector.shape_cast %140 : vector<1x16x128xf32> to vector<16x128xf32>
      %142 = vector.broadcast %139 : vector<1x128xf32> to vector<16x128xf32>
      %143 = arith.mulf %142, %141 : vector<16x128xf32>
      %144 = arith.addf %138, %143 : vector<16x128xf32>
      %145 = vector.extract_strided_slice %135 {offsets = [0, 0, 0], sizes = [1, 16, 128], strides = [1, 1, 1]} : vector<8x16x128xf32> to vector<1x16x128xf32>
      %146 = vector.shape_cast %145 : vector<1x16x128xf32> to vector<16x128xf32>
      %147 = arith.mulf %144, %146 : vector<16x128xf32>
      %cst_57 = arith.constant dense<0.000000e+00> : vector<128xf32>
      %148 = vector.multi_reduction <add>, %147, %cst_57 [0] : vector<16x128xf32> to vector<128xf32>
      %149 = vector.shape_cast %148 : vector<128xf32> to vector<1x128xf32>
      %150 = vector.extract_strided_slice %117 {offsets = [1, 0, 0], sizes = [1, 16, 128], strides = [1, 1, 1]} : vector<8x16x128xf32> to vector<1x16x128xf32>
      %151 = vector.shape_cast %150 : vector<1x16x128xf32> to vector<16x128xf32>
      %152 = arith.mulf %151, %144 : vector<16x128xf32>
      %153 = vector.extract_strided_slice %111 {offsets = [1, 0], sizes = [1, 128], strides = [1, 1]} : vector<8x128xf32> to vector<1x128xf32>
      %154 = vector.extract_strided_slice %128 {offsets = [1, 0, 0], sizes = [1, 16, 128], strides = [1, 1, 1]} : vector<8x16x128xf32> to vector<1x16x128xf32>
      %155 = vector.shape_cast %154 : vector<1x16x128xf32> to vector<16x128xf32>
      %156 = vector.broadcast %153 : vector<1x128xf32> to vector<16x128xf32>
      %157 = arith.mulf %156, %155 : vector<16x128xf32>
      %158 = arith.addf %152, %157 : vector<16x128xf32>
      %159 = vector.extract_strided_slice %135 {offsets = [1, 0, 0], sizes = [1, 16, 128], strides = [1, 1, 1]} : vector<8x16x128xf32> to vector<1x16x128xf32>
      %160 = vector.shape_cast %159 : vector<1x16x128xf32> to vector<16x128xf32>
      %161 = arith.mulf %158, %160 : vector<16x128xf32>
      %cst_58 = arith.constant dense<0.000000e+00> : vector<128xf32>
      %162 = vector.multi_reduction <add>, %161, %cst_58 [0] : vector<16x128xf32> to vector<128xf32>
      %163 = vector.shape_cast %162 : vector<128xf32> to vector<1x128xf32>
      %164 = vector.extract_strided_slice %117 {offsets = [2, 0, 0], sizes = [1, 16, 128], strides = [1, 1, 1]} : vector<8x16x128xf32> to vector<1x16x128xf32>
      %165 = vector.shape_cast %164 : vector<1x16x128xf32> to vector<16x128xf32>
      %166 = arith.mulf %165, %158 : vector<16x128xf32>
      %167 = vector.extract_strided_slice %111 {offsets = [2, 0], sizes = [1, 128], strides = [1, 1]} : vector<8x128xf32> to vector<1x128xf32>
      %168 = vector.extract_strided_slice %128 {offsets = [2, 0, 0], sizes = [1, 16, 128], strides = [1, 1, 1]} : vector<8x16x128xf32> to vector<1x16x128xf32>
      %169 = vector.shape_cast %168 : vector<1x16x128xf32> to vector<16x128xf32>
      %170 = vector.broadcast %167 : vector<1x128xf32> to vector<16x128xf32>
      %171 = arith.mulf %170, %169 : vector<16x128xf32>
      %172 = arith.addf %166, %171 : vector<16x128xf32>
      %173 = vector.extract_strided_slice %135 {offsets = [2, 0, 0], sizes = [1, 16, 128], strides = [1, 1, 1]} : vector<8x16x128xf32> to vector<1x16x128xf32>
      %174 = vector.shape_cast %173 : vector<1x16x128xf32> to vector<16x128xf32>
      %175 = arith.mulf %172, %174 : vector<16x128xf32>
      %cst_59 = arith.constant dense<0.000000e+00> : vector<128xf32>
      %176 = vector.multi_reduction <add>, %175, %cst_59 [0] : vector<16x128xf32> to vector<128xf32>
      %177 = vector.shape_cast %176 : vector<128xf32> to vector<1x128xf32>
      %178 = vector.extract_strided_slice %117 {offsets = [3, 0, 0], sizes = [1, 16, 128], strides = [1, 1, 1]} : vector<8x16x128xf32> to vector<1x16x128xf32>
      %179 = vector.shape_cast %178 : vector<1x16x128xf32> to vector<16x128xf32>
      %180 = arith.mulf %179, %172 : vector<16x128xf32>
      %181 = vector.extract_strided_slice %111 {offsets = [3, 0], sizes = [1, 128], strides = [1, 1]} : vector<8x128xf32> to vector<1x128xf32>
      %182 = vector.extract_strided_slice %128 {offsets = [3, 0, 0], sizes = [1, 16, 128], strides = [1, 1, 1]} : vector<8x16x128xf32> to vector<1x16x128xf32>
      %183 = vector.shape_cast %182 : vector<1x16x128xf32> to vector<16x128xf32>
      %184 = vector.broadcast %181 : vector<1x128xf32> to vector<16x128xf32>
      %185 = arith.mulf %184, %183 : vector<16x128xf32>
      %186 = arith.addf %180, %185 : vector<16x128xf32>
      %187 = vector.extract_strided_slice %135 {offsets = [3, 0, 0], sizes = [1, 16, 128], strides = [1, 1, 1]} : vector<8x16x128xf32> to vector<1x16x128xf32>
      %188 = vector.shape_cast %187 : vector<1x16x128xf32> to vector<16x128xf32>
      %189 = arith.mulf %186, %188 : vector<16x128xf32>
      %cst_60 = arith.constant dense<0.000000e+00> : vector<128xf32>
      %190 = vector.multi_reduction <add>, %189, %cst_60 [0] : vector<16x128xf32> to vector<128xf32>
      %191 = vector.shape_cast %190 : vector<128xf32> to vector<1x128xf32>
      %192 = vector.extract_strided_slice %117 {offsets = [4, 0, 0], sizes = [1, 16, 128], strides = [1, 1, 1]} : vector<8x16x128xf32> to vector<1x16x128xf32>
      %193 = vector.shape_cast %192 : vector<1x16x128xf32> to vector<16x128xf32>
      %194 = arith.mulf %193, %186 : vector<16x128xf32>
      %195 = vector.extract_strided_slice %111 {offsets = [4, 0], sizes = [1, 128], strides = [1, 1]} : vector<8x128xf32> to vector<1x128xf32>
      %196 = vector.extract_strided_slice %128 {offsets = [4, 0, 0], sizes = [1, 16, 128], strides = [1, 1, 1]} : vector<8x16x128xf32> to vector<1x16x128xf32>
      %197 = vector.shape_cast %196 : vector<1x16x128xf32> to vector<16x128xf32>
      %198 = vector.broadcast %195 : vector<1x128xf32> to vector<16x128xf32>
      %199 = arith.mulf %198, %197 : vector<16x128xf32>
      %200 = arith.addf %194, %199 : vector<16x128xf32>
      %201 = vector.extract_strided_slice %135 {offsets = [4, 0, 0], sizes = [1, 16, 128], strides = [1, 1, 1]} : vector<8x16x128xf32> to vector<1x16x128xf32>
      %202 = vector.shape_cast %201 : vector<1x16x128xf32> to vector<16x128xf32>
      %203 = arith.mulf %200, %202 : vector<16x128xf32>
      %cst_61 = arith.constant dense<0.000000e+00> : vector<128xf32>
      %204 = vector.multi_reduction <add>, %203, %cst_61 [0] : vector<16x128xf32> to vector<128xf32>
      %205 = vector.shape_cast %204 : vector<128xf32> to vector<1x128xf32>
      %206 = vector.extract_strided_slice %117 {offsets = [5, 0, 0], sizes = [1, 16, 128], strides = [1, 1, 1]} : vector<8x16x128xf32> to vector<1x16x128xf32>
      %207 = vector.shape_cast %206 : vector<1x16x128xf32> to vector<16x128xf32>
      %208 = arith.mulf %207, %200 : vector<16x128xf32>
      %209 = vector.extract_strided_slice %111 {offsets = [5, 0], sizes = [1, 128], strides = [1, 1]} : vector<8x128xf32> to vector<1x128xf32>
      %210 = vector.extract_strided_slice %128 {offsets = [5, 0, 0], sizes = [1, 16, 128], strides = [1, 1, 1]} : vector<8x16x128xf32> to vector<1x16x128xf32>
      %211 = vector.shape_cast %210 : vector<1x16x128xf32> to vector<16x128xf32>
      %212 = vector.broadcast %209 : vector<1x128xf32> to vector<16x128xf32>
      %213 = arith.mulf %212, %211 : vector<16x128xf32>
      %214 = arith.addf %208, %213 : vector<16x128xf32>
      %215 = vector.extract_strided_slice %135 {offsets = [5, 0, 0], sizes = [1, 16, 128], strides = [1, 1, 1]} : vector<8x16x128xf32> to vector<1x16x128xf32>
      %216 = vector.shape_cast %215 : vector<1x16x128xf32> to vector<16x128xf32>
      %217 = arith.mulf %214, %216 : vector<16x128xf32>
      %cst_62 = arith.constant dense<0.000000e+00> : vector<128xf32>
      %218 = vector.multi_reduction <add>, %217, %cst_62 [0] : vector<16x128xf32> to vector<128xf32>
      %219 = vector.shape_cast %218 : vector<128xf32> to vector<1x128xf32>
      %220 = vector.extract_strided_slice %117 {offsets = [6, 0, 0], sizes = [1, 16, 128], strides = [1, 1, 1]} : vector<8x16x128xf32> to vector<1x16x128xf32>
      %221 = vector.shape_cast %220 : vector<1x16x128xf32> to vector<16x128xf32>
      %222 = arith.mulf %221, %214 : vector<16x128xf32>
      %223 = vector.extract_strided_slice %111 {offsets = [6, 0], sizes = [1, 128], strides = [1, 1]} : vector<8x128xf32> to vector<1x128xf32>
      %224 = vector.extract_strided_slice %128 {offsets = [6, 0, 0], sizes = [1, 16, 128], strides = [1, 1, 1]} : vector<8x16x128xf32> to vector<1x16x128xf32>
      %225 = vector.shape_cast %224 : vector<1x16x128xf32> to vector<16x128xf32>
      %226 = vector.broadcast %223 : vector<1x128xf32> to vector<16x128xf32>
      %227 = arith.mulf %226, %225 : vector<16x128xf32>
      %228 = arith.addf %222, %227 : vector<16x128xf32>
      %229 = vector.extract_strided_slice %135 {offsets = [6, 0, 0], sizes = [1, 16, 128], strides = [1, 1, 1]} : vector<8x16x128xf32> to vector<1x16x128xf32>
      %230 = vector.shape_cast %229 : vector<1x16x128xf32> to vector<16x128xf32>
      %231 = arith.mulf %228, %230 : vector<16x128xf32>
      %cst_63 = arith.constant dense<0.000000e+00> : vector<128xf32>
      %232 = vector.multi_reduction <add>, %231, %cst_63 [0] : vector<16x128xf32> to vector<128xf32>
      %233 = vector.shape_cast %232 : vector<128xf32> to vector<1x128xf32>
      %234 = vector.extract_strided_slice %117 {offsets = [7, 0, 0], sizes = [1, 16, 128], strides = [1, 1, 1]} : vector<8x16x128xf32> to vector<1x16x128xf32>
      %235 = vector.shape_cast %234 : vector<1x16x128xf32> to vector<16x128xf32>
      %236 = arith.mulf %235, %228 : vector<16x128xf32>
      %237 = vector.extract_strided_slice %111 {offsets = [7, 0], sizes = [1, 128], strides = [1, 1]} : vector<8x128xf32> to vector<1x128xf32>
      %238 = vector.extract_strided_slice %128 {offsets = [7, 0, 0], sizes = [1, 16, 128], strides = [1, 1, 1]} : vector<8x16x128xf32> to vector<1x16x128xf32>
      %239 = vector.shape_cast %238 : vector<1x16x128xf32> to vector<16x128xf32>
      %240 = vector.broadcast %237 : vector<1x128xf32> to vector<16x128xf32>
      %241 = arith.mulf %240, %239 : vector<16x128xf32>
      %242 = arith.addf %236, %241 : vector<16x128xf32>
      %243 = vector.extract_strided_slice %135 {offsets = [7, 0, 0], sizes = [1, 16, 128], strides = [1, 1, 1]} : vector<8x16x128xf32> to vector<1x16x128xf32>
      %244 = vector.shape_cast %243 : vector<1x16x128xf32> to vector<16x128xf32>
      %245 = arith.mulf %242, %244 : vector<16x128xf32>
      %cst_64 = arith.constant dense<0.000000e+00> : vector<128xf32>
      %246 = vector.multi_reduction <add>, %245, %cst_64 [0] : vector<16x128xf32> to vector<128xf32>
      %247 = vector.shape_cast %246 : vector<128xf32> to vector<1x128xf32>
      %248 = tpu.concatenate %149, %163, %177, %191, %205, %219, %233, %247 in 0 : vector<1x128xf32>, vector<1x128xf32>, vector<1x128xf32>, vector<1x128xf32>, vector<1x128xf32>, vector<1x128xf32>, vector<1x128xf32>, vector<1x128xf32> -> vector<8x128xf32>
      %249 = arith.index_cast %91 : i32 to index
      %c0_65 = arith.constant 0 : index
      %250 = vector.load %arg14[%249, %c0_65] : memref<64x128xf32, #tpu.memory_space<vmem>>, vector<8x128xf32>
      tpu.vector_store %arg14[%249, %c0_65], %248 {strides = array<i32>} : memref<64x128xf32, #tpu.memory_space<vmem>>, vector<8x128xf32>,
      scf.yield %242 : vector<16x128xf32>
    }
    %c8_i32_30 = arith.constant 8 : i32
    %c0_31 = arith.constant 0 : index
    %c0_32 = arith.constant 0 : index
    %67 = vector.load %arg14[%c0_31, %c0_32] : memref<64x128xf32, #tpu.memory_space<vmem>>, vector<64x128xf32>
    %c0_33 = arith.constant 0 : index
    %c0_34 = arith.constant 0 : index
    %68 = vector.load %arg12[%c0_33, %c0_34] : memref<64x128xf32, #tpu.memory_space<vmem>>, vector<64x128xf32>
    %c0_35 = arith.constant 0 : index
    %c0_36 = arith.constant 0 : index
    %69 = vector.load %arg8[%c0_35, %c0_36] : memref<1x128xf32, #tpu.memory_space<vmem>>, vector<1x128xf32>
    %70 = vector.broadcast %69 : vector<1x128xf32> to vector<64x128xf32>
    %71 = arith.mulf %68, %70 : vector<64x128xf32>
    %72 = arith.addf %67, %71 : vector<64x128xf32>
    %c0_37 = arith.constant 0 : index
    %c0_38 = arith.constant 0 : index
    %73 = vector.load %arg13[%c0_37, %c0_38] : memref<64x128xf32, #tpu.memory_space<vmem>>, vector<64x128xf32>
    %cst_39 = arith.constant 0.000000e+00 : f32
    %74 = vector.broadcast %cst_39 : f32 to vector<64x128xf32>
    %75 = arith.subf %74, %73 : vector<64x128xf32>
    %76 = math.exp %75 : vector<64x128xf32>
    %cst_40 = arith.constant 1.000000e+00 : f32
    %77 = vector.broadcast %cst_40 : f32 to vector<64x128xf32>
    %78 = arith.addf %77, %76 : vector<64x128xf32>
    %cst_41 = arith.constant 1.000000e+00 : f32
    %79 = vector.broadcast %cst_41 : f32 to vector<64x128xf32>
    %80 = arith.divf %79, %78 : vector<64x128xf32>
    %81 = arith.mulf %73, %80 : vector<64x128xf32>
    %82 = arith.mulf %72, %81 : vector<64x128xf32>
    %c0_42 = arith.constant 0 : index
    %c0_43 = arith.constant 0 : index
    %83 = vector.load %arg9[%c0_42, %c0_43] : memref<128x64xf32, #tpu.memory_space<vmem>>, vector<128x64xf32>
    %cst_44 = arith.constant dense<0.000000e+00> : vector<64x64xf32>
    %84 = tpu.matmul %82, %83, %cst_44 {dimension_numbers = #tpu.dot_dimension_numbers<[1], [0], [0], [1], [0, 0, 1, 1], [], []>} : vector<64x128xf32>, vector<128x64xf32>, vector<64x64xf32> -> vector<64x64xf32>
    %c0_45 = arith.constant 0 : index
    %c0_46 = arith.constant 0 : index
    %85 = vector.load %arg1[%c0_45, %c0_46] : memref<128x32xf32, #tpu.memory_space<vmem>>, vector<64x32xf32>
    %c64 = arith.constant 64 : index
    %c0_47 = arith.constant 0 : index
    %86 = vector.load %arg1[%c64, %c0_47] : memref<128x32xf32, #tpu.memory_space<vmem>>, vector<64x32xf32>
    %87 = tpu.concatenate %85, %86 in 1 : vector<64x32xf32>, vector<64x32xf32> -> vector<64x64xf32>
    %88 = arith.addf %84, %87 : vector<64x64xf32>
    %c0_48 = arith.constant 0 : index
    %c0_49 = arith.constant 0 : index
    %89 = vector.load %arg10[%c0_48, %c0_49] : memref<64x64xf32, #tpu.memory_space<vmem>>, vector<64x64xf32>
    tpu.vector_store %arg10[%c0_48, %c0_49], %88 {strides = array<i32>} : memref<64x64xf32, #tpu.memory_space<vmem>>, vector<64x64xf32>,
    return
  }
  func.func @transform_0(%arg0: i32) -> (i32, i32) {
    %c0_i32 = arith.constant 0 : i32
    %c0_i32_0 = arith.constant 0 : i32
    %c0_i32_1 = arith.constant 0 : i32
    return %c0_i32, %c0_i32_0 : i32, i32
  }
  func.func @transform_1(%arg0: i32) -> (i32, i32) {
    %c0_i32 = arith.constant 0 : i32
    %c0_i32_0 = arith.constant 0 : i32
    %c0_i32_1 = arith.constant 0 : i32
    return %c0_i32, %c0_i32_0 : i32, i32
  }
  func.func @transform_2(%arg0: i32) -> (i32, i32) {
    %c0_i32 = arith.constant 0 : i32
    %c0_i32_0 = arith.constant 0 : i32
    %c0_i32_1 = arith.constant 0 : i32
    return %c0_i32, %c0_i32_0 : i32, i32
  }
  func.func @transform_3(%arg0: i32) -> (i32, i32) {
    %c0_i32 = arith.constant 0 : i32
    %c0_i32_0 = arith.constant 0 : i32
    %c0_i32_1 = arith.constant 0 : i32
    return %c0_i32, %c0_i32_0 : i32, i32
  }
  func.func @transform_4(%arg0: i32) -> (i32, i32) {
    %c0_i32 = arith.constant 0 : i32
    %c0_i32_0 = arith.constant 0 : i32
    %c0_i32_1 = arith.constant 0 : i32
    return %c0_i32, %c0_i32_0 : i32, i32
  }
  func.func @transform_5(%arg0: i32) -> (i32, i32) {
    %c0_i32 = arith.constant 0 : i32
    %c0_i32_0 = arith.constant 0 : i32
    %c0_i32_1 = arith.constant 0 : i32
    return %c0_i32, %c0_i32_0 : i32, i32
  }
  func.func @transform_6(%arg0: i32) -> (i32, i32) {
    %c0_i32 = arith.constant 0 : i32
    %c0_i32_0 = arith.constant 0 : i32
    %c0_i32_1 = arith.constant 0 : i32
    return %c0_i32, %c0_i32_0 : i32, i32
  }
  func.func @transform_7(%arg0: i32) -> (i32, i32) {
    %c0_i32 = arith.constant 0 : i32
    %c0_i32_0 = arith.constant 0 : i32
    %c0_i32_1 = arith.constant 0 : i32
    return %c0_i32, %c0_i32_0 : i32, i32
  }
  func.func @transform_8(%arg0: i32) -> (i32, i32) {
    %c0_i32 = arith.constant 0 : i32
    %c0_i32_0 = arith.constant 0 : i32
    %c0_i32_1 = arith.constant 0 : i32
    return %c0_i32, %c0_i32_0 : i32, i32
  }
  func.func @transform_9(%arg0: i32) -> (i32, i32) {
    %c0_i32 = arith.constant 0 : i32
    %c0_i32_0 = arith.constant 0 : i32
    %c0_i32_1 = arith.constant 0 : i32
    return %c0_i32, %c0_i32_0 : i32, i32
  }
}

</mosaic_0001>

<bundles_post_ra>
// kernel: tpu_custom_call.1
= control target key start
LH: loop header
LB: loop body
LE: loop exit
PB: predicated region body
PF: predicated region fallthrough
CT: control target
= control target key end

     0   :  { %vm65_vm0 = vcmask 261120   ;;  %s3756_s0 = inlined_call_operand.vmem [shape: f32[128,32], index: 0, kind: input, shape index: {}]   ;;  %s3757_s1 = inlined_call_operand.vmem [shape: f32[32,128], index: 1, kind: input, shape index: {}]   ;;  %s3758_s2 = inlined_call_operand.vmem [shape: f32[3,128], index: 2, kind: input, shape index: {}]   ;;  %s3759_s3 = inlined_call_operand.vmem [shape: f32[1,128], index: 3, kind: input, shape index: {}]   ;;  %s3760_s4 = inlined_call_operand.vmem [shape: f32[128,192], index: 4, kind: input, shape index: {}]   ;;  %s3761_s5 = inlined_call_operand.vmem [shape: f32[1,128], index: 5, kind: input, shape index: {}]   ;;  %s3762_s6 = inlined_call_operand.vmem [shape: f32[16,128], index: 6, kind: input, shape index: {}]   ;;  %s3763_s7 = inlined_call_operand.vmem [shape: f32[1,128], index: 7, kind: input, shape index: {}]   ;;  %s3764_s8 = inlined_call_operand.vmem [shape: f32[128,64], index: 8, kind: input, shape index: {}]   ;;  %s3765_s9 = inlined_call_operand.hbm [shape: f32[64,64], index: 9, kind: output, shape index: {}]  }
   0x1   :  { %v2369_v0 = vld [vmem:[%s3756_s0] sm:$0xff]  ;;  %v2374_v1 = vld [vmem:[%s3756_s0 + $0x10] sm:$0xff]  ;;  %v2390_v6 = vld [vmem:[%s3756_s0 + $0x8] sm:$0xff] }
   0x2   :  { %v2379_v2 = vld [vmem:[%s3756_s0 + $0x20] sm:$0xff]  ;;  %v49_v3 = vmul.f32 %v2369_v0, %v2369_v0  ;;  %v51_v4 = vmul.f32 %v2374_v1, %v2374_v1  ;;  %v2395_v7 = vld [vmem:[%s3756_s0 + $0x18] sm:$0xff]  ;;  %v2403_v11 = vld [vmem:[%s3756_s0 + $0x28] sm:$0xff]  ;;  %v50_v12 = vmul.f32 %v2390_v6, %v2390_v6 }
   0x3   :  { %v53_v5 = vmul.f32 %v2379_v2, %v2379_v2  ;;  %v52_v13 = vmul.f32 %v2395_v7, %v2395_v7 }
   0x4   :  { %v66_v8 = vsel %vm65_vm0, %v49_v3, 0.0  ;;  %v72_v9 = vsel %vm65_vm0, %v51_v4, 0.0 }
   0x5   :  { %v78_v10 = vsel %vm65_vm0, %v53_v5, 0.0  ;;  %67 = vadd.xlane.f32.xlu0 %v66_v8  ;;  %73 = vadd.xlane.f32.xlu1 %v72_v9 }
   0x6   :  { %79 = vadd.xlane.f32.xlu2 %v78_v10 }
   0x7   :  { %14 = vsyncpa [#allocation7], 0  ;;  %v54_v14 = vmul.f32 %v2403_v11, %v2403_v11  ;;  %v69_v15 = vsel %vm65_vm0, %v50_v12, 0.0  ;;  %v75_v16 = vsel %vm65_vm0, %v52_v13, 0.0  ;;  %v2417_v18 = vld [vmem:[%s3756_s0 + $0x60] sm:$0xff]  ;;  %v2422_v19 = vld [vmem:[%s3756_s0 + $0x30] sm:$0xff] }
   0x8   :  { %v2427_v20 = vld [vmem:[%s3756_s0 + $0x68] sm:$0xff]  ;;  %v61_v21 = vmul.f32 %v2417_v18, %v2417_v18  ;;  %v55_v22 = vmul.f32 %v2422_v19, %v2422_v19  ;;  %v2441_v27 = vld [vmem:[%s3756_s0 + $0x70] sm:$0xff]  ;;  %v2446_v28 = vld [vmem:[%s3756_s0 + $0x38] sm:$0xff]  ;;  %v2310_v48 = vmov 32.0  }
   0x9   :  { %v81_v17 = vsel %vm65_vm0, %v54_v14, 0.0  ;;  %v62_v23 = vmul.f32 %v2427_v20, %v2427_v20  ;;  %v2451_v29 = vld [vmem:[%s3756_s0 + $0x40] sm:$0xff]  ;;  %v63_v30 = vmul.f32 %v2441_v27, %v2441_v27  ;;  %v56_v31 = vmul.f32 %v2446_v28, %v2446_v28  ;;  %v2464_v35 = vld [vmem:[%s3756_s0 + $0x78] sm:$0xff]  ;;  %v2470_v37 = vld [vmem:[%s3756_s0 + $0x48] sm:$0xff] }
   0xa   :  { %v102_v24 = vsel %vm65_vm0, %v61_v21, 0.0  ;;  %v84_v25 = vsel %vm65_vm0, %v55_v22, 0.0  ;;  %v57_v32 = vmul.f32 %v2451_v29, %v2451_v29  ;;  %v2475_v38 = vld [vmem:[%s3756_s0 + $0x50] sm:$0xff]  ;;  %v64_v39 = vmul.f32 %v2464_v35, %v2464_v35  ;;  %v2489_v45 = vld [vmem:[%s3756_s0 + $0x58] sm:$0xff]  ;;  %v330_v54 = vld [vmem:[%s3757_s1 + $0x8] sm:$0xff] }
   0xb   :  { %v105_v26 = vsel %vm65_vm0, %v62_v23, 0.0  ;;  %v108_v33 = vsel %vm65_vm0, %v63_v30, 0.0  ;;  %v87_v34 = vsel %vm65_vm0, %v56_v31, 0.0  ;;  %v58_v40 = vmul.f32 %v2470_v37, %v2470_v37  ;;  %v332_v51 = vld [vmem:[%s3757_s1 + $0x18] sm:$0xff]  ;;  %v331_v53 = vld [vmem:[%s3757_s1 + $0x10] sm:$0xff]  ;;  %v329_v56 = vld [vmem:[%s3757_s1] sm:$0xff] }
   0xc   :  { %v90_v36 = vsel %vm65_vm0, %v57_v32, 0.0  ;;  %v59_v41 = vmul.f32 %v2475_v38, %v2475_v38  ;;  %v111_v42 = vsel %vm65_vm0, %v64_v39, 0.0  ;;  %v60_v46 = vmul.f32 %v2489_v45, %v2489_v45  ;;  %393 = vmatpush.msra.mxu0 %v332_v51  ;;  %2052 = vmatpush.msra.mxu1 %v332_v51  ;;  %s2311_s1 = smov 64  }
   0xd   :  { %70 = vadd.xlane.f32.xlu0 %v69_v15  ;;  %76 = vadd.xlane.f32.xlu1 %v75_v16  ;;  %v93_v43 = vsel %vm65_vm0, %v58_v40, 0.0  ;;  %2087 = vrcp.f32 %v2310_v48 }
   0xe   :  { %82 = vadd.xlane.f32.xlu2 %v81_v17  ;;  %v96_v44 = vsel %vm65_vm0, %v59_v41, 0.0  ;;  %v99_v47 = vsel %vm65_vm0, %v60_v46, 0.0  ;;  %394 = vmatpush.msra.mxu0 %v331_v53 }
   0xf   :  { %2053 = vmatpush.msra.mxu1 %v331_v53 }
  0x10   :  { %395 = vmatpush.msra.mxu0 %v330_v54 }
  0x11   :  { %2054 = vmatpush.msra.mxu1 %v330_v54 }
  0x12   :  { %396 = vmatpush.msra.mxu0 %v329_v56 }
  0x13   :  { %v2088_v49 = vpop.eup %2087  ;;  %2055 = vmatpush.msra.mxu1 %v329_v56 }
  0x14   :  { %v115_v50 = vmul.f32 32.0, %v2088_v49  ;;  %vm119_vm1 = vweird.f32 %v2088_v49 }
  0x15   :  { %103 = vadd.xlane.f32.xlu0 %v102_v24  ;;  %85 = vadd.xlane.f32.xlu1 %v84_v25 }
  0x16   :  { %106 = vadd.xlane.f32.xlu2 %v105_v26  ;;  %v116_v52 = vsub.f32 1.0, %v115_v50 }
  0x18   :  { %v117_v55 = vmul.f32 %v2088_v49, %v116_v52 }
  0x1a   :  { %v118_v57 = vadd.f32 %v2088_v49, %v117_v55 }
  0x1c   :  { %v2506_v58 = vsel %vm119_vm1, %v2088_v49, %v118_v57 }
  0x1d   :  { %109 = vadd.xlane.f32.xlu1 %v108_v33  ;;  %88 = vadd.xlane.f32.xlu0 %v87_v34 }
  0x1e   :  { %91 = vadd.xlane.f32.xlu2 %v90_v36 }
  0x25   :  { %112 = vadd.xlane.f32.xlu0 %v111_v42  ;;  %94 = vadd.xlane.f32.xlu1 %v93_v43 }
  0x26   :  { %97 = vadd.xlane.f32.xlu2 %v96_v44 }
  0x2d   :  { %100 = vadd.xlane.f32.xlu0 %v99_v47 }
  0x78   :  { %v68_v59 = vpop.xlane.xlu0 %67  ;;  %v74_v60 = vpop.xlane.xlu1 %73 }
  0x79   :  { %v121_v61 = vmul.f32 %v2506_v58, %v68_v59  ;;  %v80_v62 = vpop.xlane.xlu2 %79  ;;  %v123_v63 = vmul.f32 %v2506_v58, %v74_v60 }
  0x7a   :  { %v125_v25 = vmul.f32 %v2506_v58, %v80_v62 }
  0x7b   :  { %v137_v3 = vadd.f32 1e-05, %v121_v61  ;;  %v2510_v4 = vadd.f32 1e-05, %v123_v63 }
  0x7c   :  { %v2529_v41 = vadd.f32 1e-05, %v125_v25 }
  0x7d   :  { %2089 = vrsqrt.f32 %v137_v3  ;;  %vm159_vm3 = vweird.f32 %v137_v3  ;;  %vm179_vm8 = vweird.f32 %v2510_v4 }
  0x7e   :  { %2091 = vrsqrt.f32 %v2510_v4 }
  0x80   :  { %v71_v5 = vpop.xlane.xlu0 %70  ;;  %v77_v8 = vpop.xlane.xlu1 %76 }
  0x81   :  { %v122_v9 = vmul.f32 %v2506_v58, %v71_v5  ;;  %v83_v10 = vpop.xlane.xlu2 %82  ;;  %v124_v14 = vmul.f32 %v2506_v58, %v77_v8 }
  0x82   :  { %v126_v52 = vmul.f32 %v2506_v58, %v83_v10 }
  0x83   :  { %v2090_v12 = vpop.eup %2089  ;;  %v138_v13 = vadd.f32 1e-05, %v122_v9  ;;  %v2515_v17 = vadd.f32 1e-05, %v124_v14 }
  0x84   :  { %v154_v15 = vmul.f32 %v2090_v12, %v137_v3  ;;  %v2517_v21 = vpop.eup %2091  ;;  %vm160_vm2 = vweird.f32 %v2090_v12  ;;  %v2551_v3 = vadd.f32 1e-05, %v126_v52 }
  0x85   :  { %2093 = vrsqrt.f32 %v138_v13  ;;  %v174_v33 = vmul.f32 %v2517_v21, %v2510_v4  ;;  %vm161_vm4 = vmor %vm159_vm3, %vm160_vm2  ;;  %vm169_vm6 = vweird.f32 %v138_v13  ;;  %vm180_vm11 = vweird.f32 %v2517_v21 }
  0x86   :  { %v155_v16 = vmul.f32 %v2090_v12, %v154_v15  ;;  %2095 = vrsqrt.f32 %v2515_v17  ;;  %vm2583_vm15 = vmor %vm179_vm8, %vm180_vm11  ;;  %vm189_vm2 = vweird.f32 %v2515_v17  ;;  %vm199_vm8 = vweird.f32 %v2529_v41 }
  0x87   :  { %v175_v43 = vmul.f32 %v2517_v21, %v174_v33 }
  0x88   :  { %v156_v22 = vmul.f32 0.5, %v155_v16  ;;  %v104_v23 = vpop.xlane.xlu0 %103  ;;  %v2519_v24 = vpop.xlane.xlu1 %85 }
  0x89   :  { %v133_v26 = vmul.f32 %v2506_v58, %v104_v23  ;;  %v107_v30 = vpop.xlane.xlu2 %106  ;;  %v176_v55 = vmul.f32 0.5, %v175_v43 }
  0x8a   :  { %v134_v31 = vmul.f32 %v2506_v58, %v107_v30  ;;  %v157_v36 = vsub.f32 1.5, %v156_v22 }
  0x8b   :  { %v2094_v32 = vpop.eup %2093  ;;  %v149_v34 = vadd.f32 1e-05, %v133_v26  ;;  %v177_v8 = vsub.f32 1.5, %v176_v55  ;;  %v127_v26 = vmul.f32 %v2506_v58, %v2519_v24 }
  0x8c   :  { %v164_v39 = vmul.f32 %v2094_v32, %v138_v13  ;;  %v2527_v40 = vadd.f32 1e-05, %v134_v31  ;;  %v158_v46 = vmul.f32 %v2090_v12, %v157_v36  ;;  %v2535_v49 = vpop.eup %2095  ;;  %vm170_vm5 = vweird.f32 %v2094_v32 }
  0x8d   :  { %2097 = vrsqrt.f32 %v149_v34  ;;  %v184_v60 = vmul.f32 %v2535_v49, %v2515_v17  ;;  %vm171_vm7 = vmor %vm169_vm6, %vm170_vm5  ;;  %vm279_vm9 = vweird.f32 %v149_v34  ;;  %v178_v33 = vmul.f32 %v2517_v21, %v177_v8 }
  0x8e   :  { %v165_v42 = vmul.f32 %v2094_v32, %v164_v39  ;;  %2099 = vrsqrt.f32 %v2527_v40  ;;  %v162_v53 = vsel %vm161_vm4, %v2090_v12, %v158_v46  ;;  %vm289_vm13 = vweird.f32 %v2527_v40 }
  0x8f   :  { %2101 = vrsqrt.f32 %v2529_v41  ;;  %v313_v56 = vmul.f32 %v162_v53, %v2369_v0  ;;  %v185_v12 = vmul.f32 %v2535_v49, %v184_v60  ;;  %v2597_v4 = vadd.f32 1e-05, %v127_v26 }
  0x90   :  { %v166_v44 = vmul.f32 0.5, %v165_v42  ;;  %v110_v47 = vpop.xlane.xlu1 %109  ;;  %v2533_v48 = vpop.xlane.xlu0 %88  ;;  %v182_v53 = vsel %vm2583_vm15, %v2517_v21, %v178_v33  ;;  %vm190_vm3 = vweird.f32 %v2535_v49 }
  0x91   :  { %v135_v50 = vmul.f32 %v2506_v58, %v110_v47  ;;  %2032 = vmatmul.msk.f32.vlgmr.msra.gmra.mxu0 %vm65_vm0, %v313_v56  ;;  %v128_v21 = vmul.f32 %v2506_v58, %v2533_v48  ;;  %vm2624_vm6 = vmor %vm189_vm2, %vm190_vm3  ;;  %vm219_vm2 = vweird.f32 %v2597_v4 }
  0x92   :  { %v167_v51 = vsub.f32 1.5, %v166_v44 }
  0x93   :  { %v2098_v54 = vpop.eup %2097  ;;  %v2541_v57 = vadd.f32 1e-05, %v135_v50 }
  0x94   :  { %v2543_v59 = vpop.eup %2099  ;;  %v274_v61 = vmul.f32 %v2098_v54, %v149_v34  ;;  %v168_v62 = vmul.f32 %v2094_v32, %v167_v51  ;;  %vm280_vm10 = vweird.f32 %v2098_v54  ;;  %v186_v34 = vmul.f32 0.5, %v185_v12  ;;  %v92_v12 = vpop.xlane.xlu2 %91 }
  0x95   :  { %v284_v63 = vmul.f32 %v2543_v59, %v2527_v40  ;;  %2103 = vrsqrt.f32 %v2541_v57  ;;  %v2553_v5 = vpop.eup %2101  ;;  %vm2568_vm12 = vmor %vm279_vm9, %vm280_vm10  ;;  %vm290_vm14 = vweird.f32 %v2543_v59  ;;  %vm299_vm4 = vweird.f32 %v2541_v57 }
  0x96   :  { %v275_v0 = vmul.f32 %v2098_v54, %v274_v61  ;;  %v172_v10 = vsel %vm171_vm7, %v2094_v32, %v168_v62  ;;  %v194_v23 = vmul.f32 %v2553_v5, %v2529_v41  ;;  %2105 = vrsqrt.f32 %v2551_v3  ;;  %vm2593_vm1 = vmor %vm289_vm13, %vm290_vm14 }
  0x97   :  { %v285_v9 = vmul.f32 %v2543_v59, %v284_v63  ;;  %v314_v16 = vmul.f32 %v172_v10, %v2390_v6  ;;  %v187_v51 = vsub.f32 1.5, %v186_v34  ;;  %v315_v61 = vmul.f32 %v182_v53, %v2374_v1 }
  0x98   :  { %v276_v13 = vmul.f32 0.5, %v275_v0  ;;  %v113_v14 = vpop.xlane.xlu0 %112  ;;  %v195_v40 = vmul.f32 %v2553_v5, %v194_v23  ;;  %vm200_vm9 = vweird.f32 %v2553_v5  ;;  %v95_v34 = vpop.xlane.xlu1 %94  ;;  %vm209_vm14 = vweird.f32 %v2551_v3 }
  0x99   :  { %v286_v15 = vmul.f32 0.5, %v285_v9  ;;  %v136_v22 = vmul.f32 %v2506_v58, %v113_v14  ;;  %2033 = vmatmul.msk.f32.gmra.mxu0 %vm65_vm0, %v314_v16  ;;  %v188_v63 = vmul.f32 %v2535_v49, %v187_v51  ;;  %v2635_v9 = vadd.f32 1e-05, %v128_v21 }
  0x9a   :  { %v277_v25 = vsub.f32 1.5, %v276_v13  ;;  %v129_v16 = vmul.f32 %v2506_v58, %v92_v12  ;;  %v130_v39 = vmul.f32 %v2506_v58, %v95_v34 }
  0x9b   :  { %v2566_v30 = vpop.eup %2103  ;;  %v287_v32 = vsub.f32 1.5, %v286_v15  ;;  %v2573_v6 = vadd.f32 1e-05, %v136_v22  ;;  %v192_v13 = vsel %vm2624_vm6, %v2535_v49, %v188_v63 }
  0x9c   :  { %v294_v36 = vmul.f32 %v2566_v30, %v2541_v57  ;;  %v278_v24 = vmul.f32 %v2098_v54, %v277_v25  ;;  %v2601_v50 = vpop.eup %2105  ;;  %vm300_vm5 = vweird.f32 %v2566_v30  ;;  %v316_v22 = vmul.f32 %v192_v13, %v2395_v7  ;;  %v98_v51 = vpop.xlane.xlu2 %97 }
  0x9d   :  { %2107 = vrsqrt.f32 %v2573_v6  ;;  %v288_v47 = vmul.f32 %v2543_v59, %v287_v32  ;;  %v204_v60 = vmul.f32 %v2601_v50, %v2551_v3  ;;  %vm2631_vm7 = vmor %vm299_vm4, %vm300_vm5  ;;  %vm309_vm10 = vweird.f32 %v2573_v6 }
  0x9e   :  { %v295_v42 = vmul.f32 %v2566_v30, %v294_v36  ;;  %v282_v43 = vsel %vm2568_vm12, %v2098_v54, %v278_v24  ;;  %v196_v54 = vmul.f32 0.5, %v195_v40  ;;  %2109 = vrsqrt.f32 %v2597_v4  ;;  %vm2656_vm12 = vmor %vm199_vm8, %vm200_vm9 }
  0x9f   :  { %v325_v46 = vmul.f32 %v282_v43, %v2417_v18  ;;  %v292_v18 = vsel %vm2593_vm1, %v2543_v59, %v288_v47  ;;  %v205_v17 = vmul.f32 %v2601_v50, %v204_v60  ;;  %2111 = vrsqrt.f32 %v2635_v9 }
  0xa0   :  { %v296_v52 = vmul.f32 0.5, %v295_v42  ;;  %v326_v48 = vmul.f32 %v292_v18, %v2427_v20  ;;  %v197_v57 = vsub.f32 1.5, %v196_v54  ;;  %v2666_v31 = vadd.f32 1e-05, %v129_v16  ;;  %v101_v60 = vpop.xlane.xlu0 %100 }
  0xa1   :  { %2044 = vmatmul.msk.f32.vlgmr.msra.gmra.mxu1 %vm65_vm0, %v325_v46  ;;  %2034 = vmatmul.msk.f32.gmra.mxu0 %vm65_vm0, %v315_v61  ;;  %v206_v23 = vmul.f32 0.5, %v205_v17  ;;  %vm210_vm15 = vweird.f32 %v2601_v50  ;;  %v146_v43 = vadd.f32 1e-05, %v130_v39  ;;  %v131_v53 = vmul.f32 %v2506_v58, %v98_v51  ;;  %v891_v51 = vld [vmem:[%s3760_s4 + $0xf8] sm:$0xff] }
  0xa2   :  { %v297_v55 = vsub.f32 1.5, %v296_v52  ;;  %v198_v49 = vmul.f32 %v2553_v5, %v197_v57  ;;  %2113 = vrsqrt.f32 %v2666_v31  ;;  %vm211_vm1 = vmor %vm209_vm14, %vm210_vm15  ;;  %vm229_vm5 = vweird.f32 %v2635_v9  ;;  %933 = vmatpush.msra.mxu2 %v891_v51  ;;  %v864_v51 = vld [vmem:[%s3760_s4 + $0x20] sm:$0xff] }
  0xa3   :  { %v2108_v56 = vpop.eup %2107  ;;  %v207_v32 = vsub.f32 1.5, %v206_v23  ;;  %2115 = vrsqrt.f32 %v146_v43  ;;  %v132_v61 = vmul.f32 %v2506_v58, %v101_v60  ;;  %vm239_vm8 = vweird.f32 %v2666_v31  ;;  %v881_v60 = vld [vmem:[%s3760_s4 + $0xa8] sm:$0xff] }
  0xa4   :  { %v304_v62 = vmul.f32 %v2108_v56, %v2573_v6  ;;  %v298_v1 = vmul.f32 %v2566_v30, %v297_v55  ;;  %v2641_v14 = vpop.eup %2109  ;;  %vm310_vm11 = vweird.f32 %v2108_v56  ;;  %v202_v6 = vsel %vm2656_vm12, %v2553_v5, %v198_v49 }
  0xa5   :  { %v214_v25 = vmul.f32 %v2641_v14, %v2597_v4  ;;  %vm2662_vm13 = vmor %vm309_vm10, %vm310_vm11  ;;  %v2112_v36 = vpop.eup %2111  ;;  %v317_v24 = vmul.f32 %v202_v6, %v2379_v2  ;;  %v208_v42 = vmul.f32 %v2601_v50, %v207_v32  ;;  %vm220_vm3 = vweird.f32 %v2641_v14 }
  0xa6   :  { %v305_v0 = vmul.f32 %v2108_v56, %v304_v62  ;;  %v302_v15 = vsel %vm2631_vm7, %v2566_v30, %v298_v1  ;;  %v224_v5 = vmul.f32 %v2112_v36, %v2635_v9  ;;  %vm221_vm4 = vmor %vm219_vm2, %vm220_vm3  ;;  %vm230_vm6 = vweird.f32 %v2112_v36 }
  0xa7   :  { %v327_v26 = vmul.f32 %v302_v15, %v2441_v27  ;;  %v215_v33 = vmul.f32 %v2641_v14, %v214_v25  ;;  %v212_v47 = vsel %vm211_vm1, %v2601_v50, %v208_v42  ;;  %v147_v50 = vadd.f32 1e-05, %v131_v53  ;;  %vm231_vm7 = vmor %vm229_vm5, %vm230_vm6 }
  0xa8   :  { %v306_v10 = vmul.f32 0.5, %v305_v0  ;;  %v225_v46 = vmul.f32 %v2112_v36, %v224_v5  ;;  %v2114_v52 = vpop.eup %2113  ;;  %v318_v2 = vmul.f32 %v212_v47, %v2403_v11  ;;  %vm249_vm11 = vweird.f32 %v146_v43  ;;  %v890_v47 = vld [vmem:[%s3760_s4 + $0xf0] sm:$0xff] }
  0xa9   :  { %2045 = vmatmul.msk.f32.gmra.mxu1 %vm65_vm0, %v326_v48  ;;  %2035 = vmatmul.msk.f32.gmra.mxu0 %vm65_vm0, %v316_v22  ;;  %v216_v40 = vmul.f32 0.5, %v215_v33  ;;  %v2116_v21 = vpop.eup %2115  ;;  %2117 = vrsqrt.f32 %v147_v50  ;;  %v148_v48 = vadd.f32 1e-05, %v132_v61  ;;  %vm240_vm9 = vweird.f32 %v2114_v52  ;;  %v878_v61 = vld [vmem:[%s3760_s4 + $0x90] sm:$0xff] }
  0xaa   :  { %v307_v20 = vsub.f32 1.5, %v306_v10  ;;  %v226_v54 = vmul.f32 0.5, %v225_v46  ;;  %v244_v63 = vmul.f32 %v2116_v21, %v146_v43  ;;  %vm241_vm10 = vmor %vm239_vm8, %vm240_vm9  ;;  %vm250_vm12 = vweird.f32 %v2116_v21  ;;  %892 = vmatpush.msrb.mxu1 %v890_v47 }
  0xab   :  { %v217_v44 = vsub.f32 1.5, %v216_v40  ;;  %2119 = vrsqrt.f32 %v148_v48  ;;  %vm259_vm14 = vweird.f32 %v147_v50  ;;  %vm269_vm2 = vweird.f32 %v148_v48 }
  0xac   :  { %v308_v30 = vmul.f32 %v2108_v56, %v307_v20  ;;  %v227_v18 = vsub.f32 1.5, %v226_v54  ;;  %v245_v1 = vmul.f32 %v2116_v21, %v244_v63  ;;  %v886_v54 = vld [vmem:[%s3760_s4 + $0xd0] sm:$0xff]  ;;  %vm478_vm5 = vcmask 523264   ;;  %v544_v63 = vld [vmem:[%s3758_s2] sm:$0x7] }
  0xad   :  { %v218_v55 = vmul.f32 %v2641_v14, %v217_v44  ;;  %vm643_vm8 = vcmask 1040384  }
  0xae   :  { %v312_v27 = vsel %vm2662_vm13, %v2108_v56, %v308_v30  ;;  %v228_v59 = vmul.f32 %v2112_v36, %v227_v18  ;;  %vm251_vm13 = vmor %vm249_vm11, %vm250_vm12  ;;  %v882_v18 = vld [vmem:[%s3760_s4 + $0xb0] sm:$0xff] }
  0xaf   :  { %v328_v3 = vmul.f32 %v312_v27, %v2464_v35  ;;  %v234_v35 = vmul.f32 %v2114_v52, %v2666_v31  ;;  %v222_v4 = vsel %vm221_vm4, %v2641_v14, %v218_v55  ;;  %v2118_v8 = vpop.eup %2117  ;;  %v884_v55 = vld [vmem:[%s3760_s4 + $0xc0] sm:$0xff] }
  0xb0   :  { %v319_v11 = vmul.f32 %v222_v4, %v2422_v19  ;;  %v232_v57 = vsel %vm231_vm7, %v2112_v36, %v228_v59  ;;  %v246_v19 = vmul.f32 0.5, %v245_v1  ;;  %v254_v17 = vmul.f32 %v2118_v8, %v147_v50  ;;  %v885_v50 = vld [vmem:[%s3760_s4 + $0xc8] sm:$0xff]  ;;  %v880_v4 = vld [vmem:[%s3760_s4 + $0xa0] sm:$0xff] }
  0xb1   :  { %2046 = vmatmul.msk.f32.gmra.mxu1 %vm65_vm0, %v327_v26  ;;  %2036 = vmatmul.msk.f32.gmra.mxu0 %vm65_vm0, %v317_v24  ;;  %v235_v56 = vmul.f32 %v2114_v52, %v234_v35  ;;  %v320_v9 = vmul.f32 %v232_v57, %v2446_v28  ;;  %v2120_v14 = vpop.eup %2119  ;;  %vm260_vm15 = vweird.f32 %v2118_v8  ;;  %v887_v35 = vld [vmem:[%s3760_s4 + $0xd8] sm:$0xff]  ;;  %v877_v1 = vld [vmem:[%s3760_s4 + $0x88] sm:$0xff]  ;;  %v874_v57 = vld [vmem:[%s3760_s4 + $0x70] sm:$0xff]  ;;  %vm584_vm7 = vcmask 1041408  }
  0xb2   :  { %v247_v10 = vsub.f32 1.5, %v246_v19  ;;  %v255_v12 = vmul.f32 %v2118_v8, %v254_v17  ;;  %v264_v16 = vmul.f32 %v2120_v14, %v148_v48  ;;  %vm261_vm1 = vmor %vm259_vm14, %vm260_vm15  ;;  %vm270_vm3 = vweird.f32 %v2120_v14  ;;  %v873_v19 = vld [vmem:[%s3760_s4 + $0x68] sm:$0xff] }
  0xb3   :  { %v236_v62 = vmul.f32 0.5, %v235_v56  ;;  %vm271_vm4 = vmor %vm269_vm2, %vm270_vm3  ;;  %v883_v56 = vld [vmem:[%s3760_s4 + $0xb8] sm:$0xff]  ;;  %v2822_v17 = vperm.slane %v544_v63, 2 }
  0xb4   :  { %v256_v15 = vmul.f32 0.5, %v255_v12  ;;  %v248_v22 = vmul.f32 %v2116_v21, %v247_v10  ;;  %v265_v49 = vmul.f32 %v2120_v14, %v264_v16 }
  0xb5   :  { %v237_v0 = vsub.f32 1.5, %v236_v62  ;;  %v879_v62 = vld [vmem:[%s3760_s4 + $0x98] sm:$0xff] }
  0xb6   :  { %v257_v28 = vsub.f32 1.5, %v256_v15  ;;  %v252_v23 = vsel %vm251_vm13, %v2116_v21, %v248_v22  ;;  %v266_v41 = vmul.f32 0.5, %v265_v49  ;;  %v871_v49 = vld [vmem:[%s3760_s4 + $0x58] sm:$0xff] }
  0xb7   :  { %v238_v58 = vmul.f32 %v2114_v52, %v237_v0  ;;  %v322_v25 = vmul.f32 %v252_v23, %v2470_v37  ;;  %v876_v0 = vld [vmem:[%s3760_s4 + $0x80] sm:$0xff] }
  0xb8   :  { %v258_v26 = vmul.f32 %v2118_v8, %v257_v28  ;;  %v267_v30 = vsub.f32 1.5, %v266_v41  ;;  %v870_v28 = vld [vmem:[%s3760_s4 + $0x50] sm:$0xff]  ;;  %v2844_v23 = vld [vmem:[%s3759_s3] ss:$0 sm:$0xff] }
  0xb9   :  { %2047 = vmatmul.msk.f32.gmra.mxu1 %vm65_vm0, %v328_v3  ;;  %2037 = vmatmul.msk.f32.gmra.mxu0 %vm65_vm0, %v318_v2  ;;  %v242_v13 = vsel %vm241_vm10, %v2114_v52, %v238_v58  ;;  %v888_v52 = vld [vmem:[%s3760_s4 + $0xe0] sm:$0xff]  ;;  %v889_v2 = vld [vmem:[%s3760_s4 + $0xe8] sm:$0xff]  ;;  %v2824_v58 = vperm.slane %v544_v63, 0 }
  0xba   :  { %v321_v20 = vmul.f32 %v242_v13, %v2451_v29  ;;  %v262_v29 = vsel %vm261_vm1, %v2118_v8, %v258_v26  ;;  %v268_v31 = vmul.f32 %v2120_v14, %v267_v30  ;;  %893 = vmatpush.msrb.mxu1 %v888_v52  ;;  %934 = vmatpush.msra.mxu2 %v889_v2  ;;  %v875_v8 = vld [vmem:[%s3760_s4 + $0x78] sm:$0xff]  ;;  %v2856_v30 = vperm.slane %v544_v63, 1 }
  0xbb   :  { %v323_v7 = vmul.f32 %v262_v29, %v2475_v38 }
  0xbc   :  { %v272_v32 = vsel %vm271_vm4, %v2120_v14, %v268_v31  ;;  %894 = vmatpush.msrb.mxu1 %v886_v54  ;;  %935 = vmatpush.msra.mxu2 %v887_v35  ;;  %v869_v31 = vld [vmem:[%s3760_s4 + $0x48] sm:$0xff] }
  0xbd   :  { %v324_v33 = vmul.f32 %v272_v32, %v2489_v45 }
  0xbe   :  { %895 = vmatpush.msrb.mxu1 %v884_v55  ;;  %936 = vmatpush.msra.mxu2 %v885_v50 }
  0xc0   :  { %896 = vmatpush.msrb.mxu1 %v882_v18  ;;  %937 = vmatpush.msra.mxu2 %v883_v56 }
  0xc1   :  { %2038 = vmatmul.msk.f32.gmra.mxu0 %vm65_vm0, %v319_v11  ;;  %v535_v11 = vlaneseq }
  0xc2   :  { %897 = vmatpush.msrb.mxu1 %v880_v4  ;;  %938 = vmatpush.msra.mxu2 %v881_v60 }
  0xc3   :  { %v2802_v48 = vshrl.u32 %v535_v11, 7 }
  0xc4   :  { %898 = vmatpush.msrb.mxu1 %v878_v61  ;;  %939 = vmatpush.msra.mxu2 %v879_v62  ;;  %v860_v62 = vld [vmem:[%s3760_s4] sm:$0xff] }
  0xc5   :  { %vm566_vm6 = vcmp.ge.s32.totalorder %v2802_v48, 2  ;;  %vm633_vm9 = vcmp.ge.s32.totalorder %v2802_v48, 1 }
  0xc6   :  { %899 = vmatpush.msrb.mxu1 %v876_v0  ;;  %940 = vmatpush.msra.mxu2 %v877_v1 }
  0xc8   :  { %900 = vmatpush.msrb.mxu1 %v874_v57  ;;  %941 = vmatpush.msra.mxu2 %v875_v8  ;;  %v861_v8 = vld [vmem:[%s3760_s4 + $0x8] sm:$0xff] }
  0xc9   :  { %2039 = vmatmul.msk.f32.gmra.mxu0 %vm65_vm0, %v320_v9  ;;  %v872_v9 = vld [vmem:[%s3760_s4 + $0x60] sm:$0xff] }
  0xca   :  { %901 = vmatpush.msrb.mxu1 %v872_v9  ;;  %942 = vmatpush.msra.mxu2 %v873_v19 }
  0xcc   :  { %902 = vmatpush.msrb.mxu1 %v870_v28  ;;  %943 = vmatpush.msra.mxu2 %v871_v49 }
  0xce   :  { %944 = vmatpush.msra.mxu2 %v869_v31 }
  0xd1   :  { %2040 = vmatmul.msk.f32.gmra.mxu0 %vm65_vm0, %v321_v20 }
  0xd9   :  { %2041 = vmatmul.msk.f32.gmra.mxu0 %vm65_vm0, %v322_v25 }
  0xe1   :  { %2042 = vmatmul.msk.f32.gmra.mxu0 %vm65_vm0, %v323_v7  ;;  %v868_v7 = vld [vmem:[%s3760_s4 + $0x40] sm:$0xff] }
  0xe2   :  { %903 = vmatpush.msrb.mxu1 %v868_v7 }
  0xe9   :  { %2043 = vmatmul.msk.f32.gmra.mxu0 %vm65_vm0, %v324_v33 }
 0x10e   :  { %v2709_v37 = vpop.f32.mrf.mxu0 }
 0x116   :  { %v2711_v6 = vpop.f32.mrf.mxu0 }
 0x11e   :  { %v2713_v34 = vpop.f32.mrf.mxu1  ;;  %v2715_v36 = vpop.f32.mrf.mxu0 }
 0x126   :  { %v2717_v27 = vpop.f32.mrf.mxu1  ;;  %v2719_v38 = vpop.f32.mrf.mxu0 }
 0x12e   :  { %v2721_v24 = vpop.f32.mrf.mxu1  ;;  %v2723_v39 = vpop.f32.mrf.mxu0 }
 0x136   :  { %v2725_v40 = vpop.f32.mrf.mxu1  ;;  %v2728_v45 = vpop.f32.mrf.mxu0 }
 0x137   :  { %468 = vrot.lane.b32.xlu2 %v2725_v40, %s2311_s1 }
 0x13e   :  { %v2730_v5 = vpop.f32.mrf.mxu0 }
 0x146   :  { %v419_v42 = vpop.f32.mrf.mxu0 }
 0x14e   :  { %v2732_v3 = vpop.f32.mrf.mxu0 }
 0x14f   :  { %454 = vrot.lane.b32.xlu1 %v2732_v3, %s2311_s1 }
 0x156   :  { %v2735_v43 = vpop.f32.mrf.mxu0 }
 0x157   :  { %456 = vrot.lane.b32.xlu0 %v2735_v43, %s2311_s1 }
 0x15e   :  { %v2738_v44 = vpop.f32.mrf.mxu0 }
 0x15f   :  { %462 = vrot.lane.b32.xlu0 %v2713_v34, %s2311_s1  ;;  %458 = vrot.lane.b32.xlu2 %v2738_v44, %s2311_s1 }
 0x166   :  { %v2742_v46 = vpop.f32.mrf.mxu0 }
 0x167   :  { %495 = vrot.lane.b32.xlu0 %v2709_v37, %s2311_s1  ;;  %464 = vrot.lane.b32.xlu2 %v2717_v27, %s2311_s1 }
 0x168   :  { %460 = vrot.lane.b32.xlu1 %v2742_v46, %s2311_s1 }
 0x16f   :  { %501 = vrot.lane.b32.xlu0 %v2719_v38, %s2311_s1  ;;  %497 = vrot.lane.b32.xlu2 %v2711_v6, %s2311_s1 }
 0x170   :  { %466 = vrot.lane.b32.xlu1 %v2721_v24, %s2311_s1 }
 0x177   :  { %507 = vrot.lane.b32.xlu0 %v2730_v5, %s2311_s1  ;;  %503 = vrot.lane.b32.xlu2 %v2723_v39, %s2311_s1 }
 0x178   :  { %499 = vrot.lane.b32.xlu1 %v2715_v36, %s2311_s1 }
 0x17f   :  { %509 = vrot.lane.b32.xlu2 %v419_v42, %s2311_s1 }
 0x180   :  { %505 = vrot.lane.b32.xlu1 %v2728_v45, %s2311_s1 }
 0x191   :  { %v469_v53 = vpop.permute.xlu2 %468 }
 0x192   :  { %v2800_v59 = vsel %vm478_vm5, %v419_v42, %v469_v53  ;;  %v865_v53 = vld [vmem:[%s3760_s4 + $0x28] sm:$0xff] }
 0x193   :  { %v575_v10 = vrot.slane %v2800_v59, 6  ;;  %v641_v12 = vrot.slane %v2800_v59, 7 }
 0x1b9   :  { %v459_v21 = vpop.permute.xlu2 %458 }
 0x1ba   :  { %v2848_v25 = vsel %vm478_vm5, %v2715_v36, %v459_v21  ;;  %v867_v36 = vld [vmem:[%s3760_s4 + $0x38] sm:$0xff] }
 0x1bb   :  { %v549_v47 = vmul.f32 %v2822_v17, %v2848_v25  ;;  %v588_v55 = vrot.slane %v2848_v25, 6  ;;  %945 = vmatpush.msra.mxu2 %v867_v36  ;;  %v647_v61 = vrot.slane %v2848_v25, 7 }
 0x1bd   :  { %v560_v11 = vadd.f32 %v2844_v23, %v549_v47  ;;  %946 = vmatpush.msra.mxu2 %v865_v53 }
 0x1c1   :  { %v455_v13 = vpop.permute.xlu1 %454  ;;  %v2828_v14 = vpop.permute.xlu2 %464 }
 0x1c2   :  { %v479_v20 = vsel %vm478_vm5, %v2709_v37, %v455_v13  ;;  %v866_v37 = vld [vmem:[%s3760_s4 + $0x30] sm:$0xff] }
 0x1c3   :  { %v547_v15 = vmul.f32 %v2822_v17, %v479_v20  ;;  %v585_v16 = vrot.slane %v479_v20, 6  ;;  %v644_v22 = vrot.slane %v479_v20, 7  ;;  %904 = vmatpush.msrb.mxu1 %v866_v37 }
 0x1c5   :  { %v607_v41 = vsel %vm584_vm7, %v575_v10, %v585_v16  ;;  %v666_v26 = vsel %vm643_vm8, %v641_v12, %v644_v22  ;;  %v558_v33 = vadd.f32 %v2844_v23, %v547_v15  ;;  %905 = vmatpush.msrb.mxu1 %v864_v51  ;;  %v2920_v15 = vsel %vm478_vm5, %v2728_v45, %v2828_v14 }
 0x1c6   :  { %v608_v29 = vsel %vm566_vm6, %v607_v41, 0.0  ;;  %v667_v32 = vsel %vm633_vm9, %v666_v26, 0.0  ;;  %v552_v14 = vmul.f32 %v2822_v17, %v2920_v15  ;;  %v653_v47 = vrot.slane %v2920_v15, 7 }
 0x1c7   :  { %v617_v42 = vmul.f32 %v2824_v58, %v608_v29  ;;  %v676_v35 = vmul.f32 %v2856_v30, %v667_v32  ;;  %v594_v32 = vrot.slane %v2920_v15, 6 }
 0x1c9   :  { %v498_v52 = vpop.permute.xlu2 %497  ;;  %v457_v2 = vpop.permute.xlu0 %456  ;;  %v625_v54 = vadd.f32 %v617_v42, %v558_v33 }
 0x1ca   :  { %v520_v50 = vsel %vm478_vm5, %v498_v52, %v2735_v43  ;;  %v480_v18 = vsel %vm478_vm5, %v2711_v6, %v457_v2  ;;  %v862_v43 = vld [vmem:[%s3760_s4 + $0x10] sm:$0xff]  ;;  %v863_v6 = vld [vmem:[%s3760_s4 + $0x18] sm:$0xff]  ;;  %v563_v2 = vadd.f32 %v2844_v23, %v552_v14 }
 0x1cb   :  { %528 = vst [vmem:[#allocation4] sm:$0xff] %v520_v50  ;;  %v548_v56 = vmul.f32 %v2822_v17, %v480_v18  ;;  %v586_v4 = vrot.slane %v480_v18, 6  ;;  %v645_v60 = vrot.slane %v480_v18, 7  ;;  %v2889_v21 = vadd.f32 %v676_v35, %v625_v54  ;;  %906 = vmatpush.msrb.mxu1 %v862_v43  ;;  %947 = vmatpush.msra.mxu2 %v863_v6 }
 0x1cd   :  { %v559_v63 = vadd.f32 %v2844_v23, %v548_v56  ;;  %v587_v0 = vsel %vm584_vm7, %v585_v16, %v586_v4  ;;  %v589_v1 = vsel %vm584_vm7, %v586_v4, %v588_v55  ;;  %v646_v57 = vsel %vm643_vm8, %v644_v22, %v645_v60  ;;  %907 = vmatpush.msrb.mxu1 %v860_v62 }
 0x1ce   :  { %v618_v9 = vmul.f32 %v2824_v58, %v587_v0  ;;  %v619_v19 = vmul.f32 %v2824_v58, %v589_v1  ;;  %v648_v13 = vsel %vm643_vm8, %v645_v60, %v647_v61  ;;  %v692_v20 = vsub.f32 0.0, %v2889_v21  ;;  %948 = vmatpush.msra.mxu2 %v861_v8 }
 0x1cf   :  { %v677_v28 = vmul.f32 %v2856_v30, %v646_v57  ;;  %v678_v29 = vmul.f32 %v2856_v30, %v648_v13 }
 0x1d0   :  { %v700_v16 = vmul.f32 1.442695, %v692_v20  ;;  %v626_v22 = vadd.f32 %v618_v9, %v559_v63  ;;  %v627_v49 = vadd.f32 %v619_v19, %v560_v11  ;;  %v554_v63 = vmul.f32 %v2822_v17, %v2800_v59 }
 0x1d1   :  { %v504_v41 = vpop.permute.xlu2 %503  ;;  %v463_v26 = vpop.permute.xlu0 %462 }
 0x1d2   :  { %v523_v7 = vsel %vm478_vm5, %v504_v41, %v2713_v34  ;;  %v483_v31 = vsel %vm478_vm5, %v2723_v39, %v463_v26  ;;  %2121 = vpow2.f32 %v700_v16  ;;  %v2928_v45 = vadd.f32 %v677_v28, %v626_v22 }
 0x1d3   :  { %531 = vst [vmem:[#allocation4 + $0x8] sm:$0xff] %v523_v7  ;;  %v592_v33 = vrot.slane %v483_v31, 6  ;;  %v2933_v37 = vadd.f32 %v678_v29, %v627_v49  ;;  %v651_v36 = vrot.slane %v483_v31, 7  ;;  %v551_v0 = vmul.f32 %v2822_v17, %v483_v31 }
 0x1d4   :  { %v693_v42 = vsub.f32 0.0, %v2928_v45  ;;  %v2971_v28 = vadd.f32 %v2844_v23, %v554_v63 }
 0x1d5   :  { %v595_v34 = vsel %vm584_vm7, %v592_v33, %v594_v32  ;;  %v694_v39 = vsub.f32 0.0, %v2933_v37  ;;  %v654_v35 = vsel %vm643_vm8, %v651_v36, %v653_v47  ;;  %v562_v49 = vadd.f32 %v2844_v23, %v551_v0 }
 0x1d6   :  { %v622_v51 = vmul.f32 %v2824_v58, %v595_v34  ;;  %v702_v52 = vmul.f32 1.442695, %v693_v42  ;;  %v681_v62 = vmul.f32 %v2856_v30, %v654_v35 }
 0x1d7   :  { %v704_v53 = vmul.f32 1.442695, %v694_v39 }
 0x1d8   :  { %v2122_v54 = vpop.eup %2121  ;;  %2123 = vpow2.f32 %v702_v52  ;;  %v630_v4 = vadd.f32 %v622_v51, %v563_v2 }
 0x1d9   :  { %v510_v50 = vpop.permute.xlu2 %509  ;;  %v496_v18 = vpop.permute.xlu0 %495  ;;  %v2946_v56 = vadd.f32 1.0, %v2122_v54  ;;  %2125 = vpow2.f32 %v704_v53 }
 0x1da   :  { %v526_v60 = vsel %vm478_vm5, %v510_v50, %v2725_v40  ;;  %v461_v11 = vpop.permute.xlu1 %460  ;;  %v519_v43 = vsel %vm478_vm5, %v496_v18, %v2732_v3  ;;  %v2960_v8 = vadd.f32 %v681_v62, %v630_v4 }
 0x1db   :  { %534 = vst [vmem:[#allocation4 + $0x38] sm:$0xff] %v526_v60  ;;  %v482_v6 = vsel %vm478_vm5, %v2719_v38, %v461_v11  ;;  %2127 = vrcp.f32 %v2946_v56  ;;  %v733_v22 = vand.u32 2147483647, %v2946_v56  ;;  %vm729_vm10 = vweird.f32 %v2946_v56 }
 0x1dc   :  { %v550_v1 = vmul.f32 %v2822_v17, %v482_v6  ;;  %v590_v40 = vrot.slane %v482_v6, 6  ;;  %527 = vst [vmem:[#allocation4 + $0x30] sm:$0xff] %v519_v43  ;;  %v649_v57 = vrot.slane %v482_v6, 7  ;;  %v735_v7 = vand.u32 2147483648, %v2946_v56 }
 0x1dd   :  { %v697_v14 = vsub.f32 0.0, %v2960_v8  ;;  %vm2991_vm11 = vcmp.eq.f32.partialorder %v733_v22, 8.507059e+37 }
 0x1de   :  { %v2124_v3 = vpop.eup %2123  ;;  %v591_v38 = vsel %vm584_vm7, %v588_v55, %v590_v40  ;;  %v593_v9 = vsel %vm584_vm7, %v590_v40, %v592_v33  ;;  %v561_v13 = vadd.f32 %v2844_v23, %v550_v1  ;;  %v650_v55 = vsel %vm643_vm8, %v647_v61, %v649_v57 }
 0x1df   :  { %v2126_v19 = vpop.eup %2125  ;;  %v620_v20 = vmul.f32 %v2824_v58, %v591_v38  ;;  %v621_v16 = vmul.f32 %v2824_v58, %v593_v9  ;;  %v2974_v41 = vadd.f32 1.0, %v2124_v3  ;;  %v652_v33 = vsel %vm643_vm8, %v649_v57, %v651_v36 }
 0x1e0   :  { %v2981_v31 = vadd.f32 1.0, %v2126_v19  ;;  %v736_v35 = vor.u32 1.1754944e-38, %v735_v7  ;;  %v679_v50 = vmul.f32 %v2856_v30, %v650_v55 }
 0x1e1   :  { %v2128_v26 = vpop.eup %2127  ;;  %v502_v29 = vpop.permute.xlu0 %501  ;;  %2129 = vrcp.f32 %v2974_v41  ;;  %v750_v51 = vand.u32 2147483648, %v2974_v41  ;;  %v628_v52 = vadd.f32 %v620_v20, %v561_v13  ;;  %v629_v36 = vadd.f32 %v621_v16, %v562_v49 }
 0x1e2   :  { %v467_v42 = vpop.permute.xlu1 %466  ;;  %v522_v34 = vsel %vm478_vm5, %v502_v29, %v2742_v46  ;;  %v725_v39 = vmul.f32 %v2128_v26, %v2946_v56  ;;  %2131 = vrcp.f32 %v2981_v31  ;;  %vm730_vm12 = vweird.f32 %v2128_v26 }
 0x1e3   :  { %v485_v25 = vsel %vm478_vm5, %v2730_v5, %v467_v42  ;;  %530 = vst [vmem:[#allocation4 + $0x10] sm:$0xff] %v522_v34  ;;  %v710_v5 = vmul.f32 1.442695, %v697_v14  ;;  %vm744_vm13 = vweird.f32 %v2974_v41  ;;  %v748_v43 = vand.u32 2147483647, %v2974_v41  ;;  %vm731_vm14 = vmor %vm729_vm10, %vm730_vm12 }
 0x1e4   :  { %v553_v2 = vmul.f32 %v2822_v17, %v485_v25  ;;  %v596_v53 = vrot.slane %v485_v25, 6  ;;  %v655_v46 = vrot.slane %v485_v25, 7  ;;  %v726_v54 = vsub.f32 1.0, %v725_v39 }
 0x1e5   :  { %v680_v17 = vmul.f32 %v2856_v30, %v652_v33  ;;  %v751_v6 = vor.u32 1.1754944e-38, %v750_v51  ;;  %v3013_v0 = vadd.f32 %v679_v50, %v628_v52  ;;  %2133 = vpow2.f32 %v710_v5 }
 0x1e6   :  { %v597_v18 = vsel %vm584_vm7, %v594_v32, %v596_v53  ;;  %v598_v4 = vsel %vm584_vm7, %v596_v53, %v575_v10  ;;  %v564_v60 = vadd.f32 %v2844_v23, %v553_v2  ;;  %v727_v11 = vmul.f32 %v2128_v26, %v726_v54 }
 0x1e7   :  { %v2130_v62 = vpop.eup %2129  ;;  %v623_v63 = vmul.f32 %v2824_v58, %v597_v18  ;;  %v656_v32 = vsel %vm643_vm8, %v653_v47, %v655_v46  ;;  %v3015_v10 = vadd.f32 %v680_v17, %v629_v36  ;;  %v624_v1 = vmul.f32 %v2824_v58, %v598_v4 }
 0x1e8   :  { %v728_v40 = vadd.f32 %v2128_v26, %v727_v11  ;;  %v740_v57 = vmul.f32 %v2130_v62, %v2974_v41  ;;  %v657_v3 = vsel %vm643_vm8, %v655_v46, %v641_v12  ;;  %v763_v47 = vand.u32 2147483647, %v2981_v31  ;;  %v2132_v9 = vpop.eup %2131 }
 0x1e9   :  { %v508_v23 = vpop.permute.xlu0 %507  ;;  %v695_v58 = vsub.f32 0.0, %v3013_v0  ;;  %v696_v12 = vsub.f32 0.0, %v3015_v10  ;;  %vm745_vm15 = vweird.f32 %v2130_v62  ;;  %v755_v56 = vmul.f32 %v2132_v9, %v2981_v31 }
 0x1ea   :  { %v500_v38 = vpop.permute.xlu1 %499  ;;  %v525_v15 = vsel %vm478_vm5, %v508_v23, %v2721_v24  ;;  %v732_v59 = vsel %vm731_vm14, %v2128_v26, %v728_v40  ;;  %v741_v13 = vsub.f32 1.0, %v740_v57  ;;  %v631_v55 = vadd.f32 %v623_v63, %v564_v60  ;;  %vm746_vm1 = vmor %vm744_vm13, %vm745_vm15 }
 0x1eb   :  { %v521_v19 = vsel %vm478_vm5, %v500_v38, %v2738_v44  ;;  %533 = vst [vmem:[#allocation4 + $0x28] sm:$0xff] %v525_v15  ;;  %v737_v24 = vsel %vm2991_vm11, %v736_v35, %v732_v59  ;;  %v706_v20 = vmul.f32 1.442695, %v695_v58  ;;  %v708_v49 = vmul.f32 1.442695, %v696_v12  ;;  %v2134_v7 = vpop.eup %2133 }
 0x1ec   :  { %529 = vst [vmem:[#allocation4 + $0x18] sm:$0xff] %v521_v19  ;;  %v844_v16 = vmul.f32 %v737_v24, %v2889_v21  ;;  %v742_v22 = vmul.f32 %v2130_v62, %v741_v13  ;;  %v756_v29 = vsub.f32 1.0, %v755_v56  ;;  %v682_v44 = vmul.f32 %v2856_v30, %v656_v32 }
 0x1ed   :  { %2135 = vpow2.f32 %v706_v20  ;;  %v632_v26 = vadd.f32 %v624_v1, %v2971_v28  ;;  %v765_v33 = vand.u32 2147483648, %v2981_v31  ;;  %v683_v42 = vmul.f32 %v2856_v30, %v657_v3 }
 0x1ee   :  { %852 = vst [vmem:[#allocation3] sm:$0xff] %v844_v16  ;;  %908 = vmatmul.f32.vlgmr.msrb.gmra.mxu1 %v844_v16  ;;  %949 = vmatmul.f32.vlgmr.msra.gmra.mxu2 %v844_v16  ;;  %v743_v14 = vadd.f32 %v2130_v62, %v742_v22  ;;  %2137 = vpow2.f32 %v708_v49  ;;  %v757_v21 = vmul.f32 %v2132_v9, %v756_v29  ;;  %vm760_vm2 = vweird.f32 %v2132_v9 }
 0x1ef   :  { %v721_v34 = vadd.f32 1.0, %v2134_v7  ;;  %v3043_v39 = vadd.f32 %v682_v44, %v631_v55  ;;  %vm749_vm3 = vcmp.eq.f32.partialorder %v748_v43, 8.507059e+37  ;;  %v3045_v25 = vadd.f32 %v683_v42, %v632_v26 }
 0x1f0   :  { %v747_v28 = vsel %vm746_vm1, %v2130_v62, %v743_v14  ;;  %v758_v52 = vadd.f32 %v2132_v9, %v757_v21  ;;  %vm759_vm4 = vweird.f32 %v2981_v31  ;;  %v766_v36 = vor.u32 1.1754944e-38, %v765_v33 }
 0x1f1   :  { %v752_v51 = vsel %vm749_vm3, %v751_v6, %v747_v28  ;;  %2139 = vrcp.f32 %v721_v34  ;;  %vm761_vm6 = vmor %vm759_vm4, %vm760_vm2  ;;  %vm764_vm9 = vcmp.eq.f32.partialorder %v763_v47, 8.507059e+37  ;;  %v698_v46 = vsub.f32 0.0, %v3043_v39 }
 0x1f2   :  { %v506_v61 = vpop.permute.xlu1 %505  ;;  %v845_v41 = vmul.f32 %v752_v51, %v2928_v45  ;;  %v762_v53 = vsel %vm761_vm6, %v2132_v9, %v758_v52  ;;  %v699_v54 = vsub.f32 0.0, %v3045_v25  ;;  %v808_v11 = vand.u32 2147483647, %v721_v34 }
 0x1f3   :  { %v524_v30 = vsel %vm478_vm5, %v506_v61, %v2717_v27  ;;  %v2136_v2 = vpop.eup %2135  ;;  %v767_v50 = vsel %vm764_vm9, %v766_v36, %v762_v53  ;;  %v712_v27 = vmul.f32 1.442695, %v698_v46  ;;  %v810_v43 = vand.u32 2147483648, %v721_v34 }
 0x1f4   :  { %532 = vst [vmem:[#allocation4 + $0x20] sm:$0xff] %v524_v30  ;;  %v2138_v35 = vpop.eup %2137  ;;  %v719_v31 = vadd.f32 1.0, %v2136_v2  ;;  %v846_v5 = vmul.f32 %v767_v50, %v2933_v37  ;;  %v714_v45 = vmul.f32 1.442695, %v699_v54  ;;  %vm804_vm11 = vweird.f32 %v721_v34 }
 0x1f5   :  { %853 = vst [vmem:[#allocation3 + $0x8] sm:$0xff] %v845_v41  ;;  %v720_v18 = vadd.f32 1.0, %v2138_v35  ;;  %vm809_vm12 = vcmp.eq.f32.partialorder %v808_v11, 8.507059e+37  ;;  %v811_v23 = vor.u32 1.1754944e-38, %v810_v43  ;;  %v3067_v43 = vld [vmem:[%s3762_s6] sm:$0xff] }
 0x1f6   :  { %911 = vmatmul.f32.gmra.mxu1 %v845_v41  ;;  %952 = vmatmul.f32.gmra.mxu2 %v845_v41  ;;  %2141 = vrcp.f32 %v719_v31  ;;  %854 = vst [vmem:[#allocation3 + $0x10] sm:$0xff] %v846_v5  ;;  %v778_v3 = vand.u32 2147483647, %v719_v31  ;;  %v780_v38 = vand.u32 2147483648, %v719_v31  ;;  %vm774_vm1 = vweird.f32 %v719_v31 }
 0x1f7   :  { %v2140_v4 = vpop.eup %2139  ;;  %2143 = vrcp.f32 %v720_v18  ;;  %v793_v15 = vand.u32 2147483647, %v720_v18  ;;  %v795_v9 = vand.u32 2147483648, %v720_v18  ;;  %vm789_vm3 = vweird.f32 %v720_v18 }
 0x1f8   :  { %v800_v17 = vmul.f32 %v2140_v4, %v721_v34  ;;  %2145 = vpow2.f32 %v712_v27  ;;  %vm805_vm10 = vweird.f32 %v2140_v4  ;;  %v781_v22 = vor.u32 1.1754944e-38, %v780_v38 }
 0x1f9   :  { %2147 = vpow2.f32 %v714_v45  ;;  %vm806_vm13 = vmor %vm804_vm11, %vm805_vm10  ;;  %vm779_vm4 = vcmp.eq.f32.partialorder %v778_v3, 8.507059e+37  ;;  %v796_v29 = vor.u32 1.1754944e-38, %v795_v9  ;;  %vm794_vm9 = vcmp.eq.f32.partialorder %v793_v15, 8.507059e+37 }
 0x1fa   :  { %v801_v60 = vsub.f32 1.0, %v800_v17  ;;  %v3083_v38 = vmov 0.0   ;;  %v3085_v15 = vmov 0.0  }
 0x1fc   :  { %v2142_v6 = vpop.eup %2141  ;;  %v802_v62 = vmul.f32 %v2140_v4, %v801_v60 }
 0x1fd   :  { %v2144_v63 = vpop.eup %2143  ;;  %v770_v37 = vmul.f32 %v2142_v6, %v719_v31  ;;  %vm775_vm14 = vweird.f32 %v2142_v6 }
 0x1fe   :  { %914 = vmatmul.f32.gmra.mxu1 %v846_v5  ;;  %955 = vmatmul.f32.gmra.mxu2 %v846_v5  ;;  %v785_v32 = vmul.f32 %v2144_v63, %v720_v18  ;;  %v803_v1 = vadd.f32 %v2140_v4, %v802_v62  ;;  %v2146_v40 = vpop.eup %2145  ;;  %vm790_vm15 = vweird.f32 %v2144_v63  ;;  %vm776_vm2 = vmor %vm774_vm1, %vm775_vm14  ;;  %v3077_v62 = vld [vmem:[%s3761_s5] sm:$0x1]  ;;  %s3087_s5 = smov 0  }
 0x1ff   :  { %v771_v57 = vsub.f32 1.0, %v770_v37  ;;  %v2148_v47 = vpop.eup %2147  ;;  %v722_v59 = vadd.f32 1.0, %v2146_v40  ;;  %vm791_vm6 = vmor %vm789_vm3, %vm790_vm15 }
 0x200   :  { %v786_v58 = vsub.f32 1.0, %v785_v32  ;;  %v807_v19 = vsel %vm806_vm13, %v2140_v4, %v803_v1  ;;  %v723_v24 = vadd.f32 1.0, %v2148_v47 }
 0x201   :  { %v772_v13 = vmul.f32 %v2142_v6, %v771_v57  ;;  %v812_v12 = vsel %vm809_vm12, %v811_v23, %v807_v19  ;;  %2149 = vrcp.f32 %v722_v59  ;;  %v825_v61 = vand.u32 2147483648, %v722_v59 }
 0x202   :  { %v787_v56 = vmul.f32 %v2144_v63, %v786_v58  ;;  %v849_v20 = vmul.f32 %v812_v12, %v2960_v8  ;;  %2151 = vrcp.f32 %v723_v24  ;;  %v823_v30 = vand.u32 2147483647, %v722_v59 }
 0x203   :  { %v773_v16 = vadd.f32 %v2142_v6, %v772_v13  ;;  %v840_v41 = vand.u32 2147483648, %v723_v24  ;;  %vm819_vm12 = vweird.f32 %v722_v59  ;;  %vm834_vm14 = vweird.f32 %v723_v24 }
 0x204   :  { %v788_v49 = vadd.f32 %v2144_v63, %v787_v56  ;;  %857 = vst [vmem:[#allocation3 + $0x28] sm:$0xff] %v849_v20  ;;  %vm824_vm15 = vcmp.eq.f32.partialorder %v823_v30, 8.507059e+37 }
 0x205   :  { %v777_v55 = vsel %vm776_vm2, %v2142_v6, %v773_v16  ;;  %v841_v54 = vor.u32 1.1754944e-38, %v840_v41  ;;  %v3072_v6 = vld [vmem:[%s3762_s6 + $0x8] sm:$0xff] }
 0x206   :  { %v782_v44 = vsel %vm779_vm4, %v781_v22, %v777_v55  ;;  %v792_v26 = vsel %vm791_vm6, %v2144_v63, %v788_v49 }
 0x207   :  { %v847_v7 = vmul.f32 %v782_v44, %v3013_v0  ;;  %v797_v14 = vsel %vm794_vm9, %v796_v29, %v792_v26  ;;  %v2150_v8 = vpop.eup %2149  ;;  %v838_v0 = vand.u32 2147483647, %v723_v24 }
 0x208   :  { %v848_v33 = vmul.f32 %v797_v14, %v3015_v10  ;;  %v2152_v42 = vpop.eup %2151  ;;  %v815_v21 = vmul.f32 %v2150_v8, %v722_v59  ;;  %vm820_vm10 = vweird.f32 %v2150_v8  ;;  %v826_v10 = vor.u32 1.1754944e-38, %v825_v61 }
 0x209   :  { %855 = vst [vmem:[#allocation3 + $0x18] sm:$0xff] %v847_v7  ;;  %917 = vmatmul.f32.gmra.mxu1 %v847_v7  ;;  %958 = vmatmul.f32.gmra.mxu2 %v847_v7  ;;  %v830_v34 = vmul.f32 %v2152_v42, %v723_v24  ;;  %vm835_vm11 = vweird.f32 %v2152_v42  ;;  %vm821_vm13 = vmor %vm819_vm12, %vm820_vm10  ;;  %vm839_vm2 = vcmp.eq.f32.partialorder %v838_v0, 8.507059e+37 }
 0x20a   :  { %856 = vst [vmem:[#allocation3 + $0x20] sm:$0xff] %v848_v33  ;;  %v816_v28 = vsub.f32 1.0, %v815_v21  ;;  %vm836_vm1 = vmor %vm834_vm14, %vm835_vm11 }
 0x20b   :  { %v831_v51 = vsub.f32 1.0, %v830_v34 }
 0x20c   :  { %v817_v52 = vmul.f32 %v2150_v8, %v816_v28 }
 0x20d   :  { %v832_v36 = vmul.f32 %v2152_v42, %v831_v51 }
 0x20e   :  { %v818_v2 = vadd.f32 %v2150_v8, %v817_v52 }
 0x20f   :  { %v833_v53 = vadd.f32 %v2152_v42, %v832_v36 }
 0x210   :  { %v822_v46 = vsel %vm821_vm13, %v2150_v8, %v818_v2 }
 0x211   :  { %920 = vmatmul.f32.gmra.mxu1 %v848_v33  ;;  %961 = vmatmul.f32.gmra.mxu2 %v848_v33  ;;  %v827_v35 = vsel %vm824_vm15, %v826_v10, %v822_v46  ;;  %v837_v50 = vsel %vm836_vm1, %v2152_v42, %v833_v53 }
 0x212   :  { %v850_v31 = vmul.f32 %v827_v35, %v3043_v39  ;;  %v842_v5 = vsel %vm839_vm2, %v841_v54, %v837_v50 }
 0x213   :  { %v851_v18 = vmul.f32 %v842_v5, %v3045_v25 }
 0x214   :  { %858 = vst [vmem:[#allocation3 + $0x30] sm:$0xff] %v850_v31 }
 0x215   :  { %859 = vst [vmem:[#allocation3 + $0x38] sm:$0xff] %v851_v18 }
 0x219   :  { %923 = vmatmul.f32.gmra.mxu1 %v849_v20  ;;  %964 = vmatmul.f32.gmra.mxu2 %v849_v20 }
 0x221   :  { %926 = vmatmul.f32.gmra.mxu1 %v850_v31  ;;  %967 = vmatmul.f32.gmra.mxu2 %v850_v31 }
 0x229   :  { %929 = vmatmul.f32.gmra.mxu1 %v851_v18  ;;  %970 = vmatmul.f32.gmra.mxu2 %v851_v18 }
 0x26b   :  { %v909_v27 = vpop.f32.mrf.mxu1 }
 0x26c   :  { %974 = vst [vmem:[#allocation2] sm:$0xff] %v909_v27 }
 0x271   :  { %v950_v45 = vpop.f32.mrf.mxu2 }
 0x272   :  { %975 = vst.msk [vmem:[#allocation2 + $0x8] sm:$0xff] %vm478_vm5, %v950_v45 }
 0x273   :  { %v912_v4 = vpop.f32.mrf.mxu1 }
 0x274   :  { %976 = vst [vmem:[#allocation2 + $0x10] sm:$0xff] %v912_v4 }
 0x279   :  { %v953_v17 = vpop.f32.mrf.mxu2 }
 0x27a   :  { %977 = vst.msk [vmem:[#allocation2 + $0x18] sm:$0xff] %vm478_vm5, %v953_v17 }
 0x27b   :  { %v915_v39 = vpop.f32.mrf.mxu1 }
 0x27c   :  { %978 = vst [vmem:[#allocation2 + $0x20] sm:$0xff] %v915_v39 }
 0x281   :  { %v956_v25 = vpop.f32.mrf.mxu2 }
 0x282   :  { %979 = vst.msk [vmem:[#allocation2 + $0x28] sm:$0xff] %vm478_vm5, %v956_v25 }
 0x286   :  { %v918_v60 = vpop.f32.mrf.mxu1 }
 0x287   :  { %980 = vst [vmem:[#allocation2 + $0x30] sm:$0xff] %v918_v60 }
 0x28c   :  { %v959_v11 = vpop.f32.mrf.mxu2 }
 0x28d   :  { %981 = vst.msk [vmem:[#allocation2 + $0x38] sm:$0xff] %vm478_vm5, %v959_v11 }
 0x28e   :  { %v921_v63 = vpop.f32.mrf.mxu1 }
 0x28f   :  { %982 = vst [vmem:[#allocation2 + $0x40] sm:$0xff] %v921_v63 }
 0x294   :  { %v962_v37 = vpop.f32.mrf.mxu2 }
 0x295   :  { %983 = vst.msk [vmem:[#allocation2 + $0x48] sm:$0xff] %vm478_vm5, %v962_v37 }
 0x296   :  { %v924_v32 = vpop.f32.mrf.mxu1 }
 0x297   :  { %984 = vst [vmem:[#allocation2 + $0x50] sm:$0xff] %v924_v32 }
 0x29c   :  { %v965_v1 = vpop.f32.mrf.mxu2 }
 0x29d   :  { %985 = vst.msk [vmem:[#allocation2 + $0x58] sm:$0xff] %vm478_vm5, %v965_v1 }
 0x29e   :  { %v927_v23 = vpop.f32.mrf.mxu1 }
 0x29f   :  { %986 = vst [vmem:[#allocation2 + $0x60] sm:$0xff] %v927_v23 }
 0x2a4   :  { %v968_v40 = vpop.f32.mrf.mxu2 }
 0x2a5   :  { %987 = vst.msk [vmem:[#allocation2 + $0x68] sm:$0xff] %vm478_vm5, %v968_v40 }
 0x2a6   :  { %v930_v57 = vpop.f32.mrf.mxu1 }
 0x2a7   :  { %988 = vst [vmem:[#allocation2 + $0x70] sm:$0xff] %v930_v57 }
 0x2ac   :  { %v971_v3 = vpop.f32.mrf.mxu2 }
 0x2ad   :  { %989 = vst.msk [vmem:[#allocation2 + $0x78] sm:$0xff] %vm478_vm5, %v971_v3 }
 0x2ae LB: > { %2155 = vset.pattern.permute.xlu2 %v2802_v48  ;;  %2154 = vset.pattern.permute.xlu1 %v2802_v48  ;;  %s3102_s6 = sshll.u32 %s2308_s5, 3  ;;  %v1107_v59 = vadd.s32 8, %v2802_v48  ;;  %v1210_v20 = vadd.s32 24, %v2802_v48  ;;  %v1204_v16 = vadd.s32 16, %v2802_v48  ;;  %v3152_v49 = vadd.s32 32, %v2802_v48  ;;  %s998_s5 = sadd.s32 1, %s2308_s5   ;;  %s2308_s5 = sphi %s3087_s5, %s998_s5   ;;  %v2304_v15 = vphi %v3085_v15, %v3375_v15   ;;  %v2300_v38 = vphi %v3083_v38, %v3391_v38  }
 0x2af   : > { %2153 = vset.pattern.permute.xlu0 %v2802_v48  ;;  %s1002_s10 = sshra.s32 %s3102_s6, 3  ;;  %v3159_v55 = vadd.s32 40, %v2802_v48  ;;  %v3169_v29 = vadd.s32 48, %v2802_v48  ;;  %v1012_v7 = vperm.slane %v3077_v62, 0  ;;  %v3188_v33 = vadd.s32 56, %v2802_v48  ;;  %s1009_s13 = scalar_lea.vmem [#allocation3], %s3102_s6 }
 0x2b0   : > { %s3105_s11 = sshll.u32 %s1002_s10, 4  ;;  %vm1652_vm6 = vcmask 1042432   ;;  %vm1654_vm9 = vcmask 1043456   ;;  %vm1656_vm10 = vcmask 1044480   ;;  %vm1658_vm11 = vcmask 1045504   ;;  %s1662_s14 = scalar_lea.vmem [#allocation5], %s3102_s6 }
 0x2b1   : > { %s1006_s12 = scalar_lea.vmem [#allocation2], %s3105_s11  ;;  %vm1660_vm12 = vcmask 1046528   ;;  %p995_p0 = scmp.ge.s32.totalorder %s998_s5, 8  }
 0x2b2   :  { %v3476_v62 = vld [vmem:[#allocation4] sm:$0xff] (%p995_p0)  ;;  %s2313_s24 = smov (%p995_p0), [#allocation6]   ;;  %s2003_s27 = sshll.u32 (%p995_p0), %s3765_s9, 4  ;;  %s2004_s27 = int_to_ptr.hbm [resolvable:$true] %s2003_s27 }
 0x2b3   :  { %s2314_s4 = smov (%p995_p0), 128   ;;  %s2315_s1 = smov (%p995_p0), 8  }
 0x2b4   : > { %v1008_v47 = vld [vmem:[%s1006_s12 + $0x8] sm:$0xff]  ;;  %v1007_v14 = vld [vmem:[%s1006_s12] sm:$0xff]  ;;  %s2312_s12 = smov (%p995_p0), 32  }
 0x2b5   : > { %v3110_v58 = vperm.slane %v1008_v47, 2  ;;  %v3112_v9 = vperm.slane %v1008_v47, 1  ;;  %v3114_v19 = vperm.slane %v1008_v47, 0  ;;  %v3120_v13 = vperm.slane %v1008_v47, 4 }
 0x2b6   : > { %v3125_v12 = vperm.slane %v1008_v47, 3  ;;  %v3130_v24 = vperm.slane %v1008_v47, 6  ;;  %v3135_v56 = vperm.slane %v1008_v47, 5  ;;  %v3144_v22 = vperm.slane %v1008_v47, 7 }
 0x2b7   : > { %1129 = vperm.xlu2 %2155, %v3110_v58   ;;  %1116 = vperm.xlu1 %2154, %v3112_v9   ;;  %v1014_v42 = vadd.f32 %v1012_v7, %v1007_v14 }
 0x2b8   : > { %1103 = vperm.xlu0 %2153, %v3114_v19  }
 0x2b9   : > { %v1015_v21 = vmin.f32 %v1014_v42, 20.0  ;;  %vm1019_vm3 = vcmp.lt.f32.partialorder %v1014_v42, -15.0  ;;  %vm1018_vm4 = vcmp.gt.f32.partialorder %v1014_v42, 20.0 }
 0x2bb   : > { %v1016_v28 = vmul.f32 1.442695, %v1015_v21 }
 0x2bd   : > { %2191 = vpow2.f32 %v1016_v28 }
 0x2bf   : > { %2158 = vset.pattern.permute.xlu2 %v1107_v59  ;;  %2156 = vset.pattern.permute.xlu1 %v1107_v59 }
 0x2c0   : > { %1155 = vperm.xlu0 %2153, %v3120_v13  }
 0x2c3   : > { %v2192_v30 = vpop.eup %2191 }
 0x2c4   : > { %v1020_v0 = vadd.f32 1.0, %v2192_v30 }
 0x2c6   : > { %2193 = vlog2.f32 %v1020_v0 }
 0x2c7   : > { %1135 = vperm.xlu2 %2158, %v3110_v58   ;;  %1122 = vperm.xlu1 %2156, %v3112_v9  }
 0x2c8   : > { %2159 = vset.pattern.permute.xlu0 %v1107_v59 }
 0x2cc   : > { %v2194_v46 = vpop.eup %2193 }
 0x2cd   : > { %v1022_v54 = vmul.f32 0.6931472, %v2194_v46 }
 0x2cf   : > { %1148 = vperm.xlu2 %2158, %v3125_v12   ;;  %2157 = vset.pattern.permute.xlu1 %v2802_v48  ;;  %v1023_v31 = vsel %vm1019_vm3, %v2192_v30, %v1022_v54 }
 0x2d0   : > { %1109 = vperm.xlu0 %2159, %v3114_v19   ;;  %v3224_v18 = vsel %vm1018_vm4, %v1014_v42, %v1023_v31 }
 0x2d1   : > { %v1034_v27 = vperm.slane %v3224_v18, 0  ;;  %v1027_v45 = vrot.slane %v3224_v18, 1  ;;  %v1028_v25 = vrot.slane %v3224_v18, 2  ;;  %v1029_v1 = vrot.slane %v3224_v18, 3 }
 0x2d3   : > { %v1050_v4 = vmul.f32 %v1034_v27, %v3067_v43  ;;  %v1035_v60 = vperm.slane %v1027_v45, 0  ;;  %v1036_v37 = vperm.slane %v1028_v25, 0  ;;  %v1051_v23 = vmul.f32 %v1034_v27, %v3072_v6 }
 0x2d5   : > { %v1066_v11 = vmul.f32 1.442695, %v1050_v4  ;;  %v1052_v32 = vmul.f32 %v1035_v60, %v3067_v43  ;;  %v1054_v47 = vmul.f32 %v1036_v37, %v3067_v43  ;;  %v1068_v7 = vmul.f32 1.442695, %v1051_v23 }
 0x2d6   : > { %v1053_v31 = vmul.f32 %v1035_v60, %v3072_v6 }
 0x2d7   : > { %2161 = vset.pattern.permute.xlu2 %v2802_v48  ;;  %1142 = vperm.xlu1 %2157, %v3125_v12   ;;  %2195 = vpow2.f32 %v1066_v11  ;;  %v1074_v21 = vmul.f32 1.442695, %v1054_v47 }
 0x2d8   : > { %1187 = vperm.xlu0 %2159, %v3130_v24  }
 0x2dd   : > { %v2196_v14 = vpop.eup %2195 }
 0x2de   : > { %v1522_v46 = vmul.f32 %v2304_v15, %v2196_v14  ;;  %v1055_v14 = vmul.f32 %v1036_v37, %v3072_v6 }
 0x2df   : > { %1168 = vperm.xlu2 %2161, %v3135_v56   ;;  %2160 = vset.pattern.permute.xlu1 %v1107_v59 }
 0x2e0   : > { %2168 = vset.pattern.permute.xlu0 %v1210_v20 }
 0x2e7   : > { %1181 = vperm.xlu2 %2161, %v3130_v24   ;;  %1161 = vperm.xlu1 %2160, %v3120_v13  }
 0x2e8   : > { %1248 = vperm.xlu0 %2168, %v3125_v12  }
 0x2ef   : > { %2163 = vset.pattern.permute.xlu2 %v1107_v59  ;;  %1174 = vperm.xlu1 %2160, %v3135_v56   ;;  %v1070_v59 = vmul.f32 1.442695, %v1052_v32 }
 0x2f0   : > { %2169 = vset.pattern.permute.xlu0 %v1204_v16 }
 0x2f1   : > { %2197 = vpow2.f32 %v1070_v59 }
 0x2f2   : > { %2199 = vpow2.f32 %v1068_v7 }
 0x2f3   : > { %2201 = vpow2.f32 %v1074_v21 }
 0x2f7   : > { %1200 = vperm.xlu2 %2163, %v3144_v22   ;;  %2162 = vset.pattern.permute.xlu1 %v2802_v48  ;;  %v2198_v25 = vpop.eup %2197  ;;  %v1887_v48 = vld [vmem:[%s3764_s8 + $0x58] sm:$0xff] (%p995_p0) }
 0x2f8   : > { %1218 = vperm.xlu0 %2169, %v3112_v9   ;;  %v2200_v23 = vpop.eup %2199 }
 0x2f9   : > { %v2202_v60 = vpop.eup %2201  ;;  %v1523_v21 = vmul.f32 %v2300_v38, %v2200_v23 }
 0x2ff   : > { %2165 = vset.pattern.permute.xlu2 %v1210_v20  ;;  %1194 = vperm.xlu1 %2162, %v3144_v22  }
 0x300   : > { %1278 = vperm.xlu0 %2169, %v3130_v24  }
 0x307   : > { %2164 = vset.pattern.permute.xlu1 %v1204_v16  ;;  %1212 = vperm.xlu2 %2165, %v3114_v19  }
 0x308   : > { %2177 = vset.pattern.permute.xlu0 %v3152_v49 }
 0x30f   : > { %2167 = vset.pattern.permute.xlu2 %v1204_v16  ;;  %1206 = vperm.xlu1 %2164, %v3114_v19  }
 0x310   : > { %1354 = vperm.xlu0 %2177, %v3125_v12  }
 0x311   : > { %v3171_v44 = vpop.permute.xlu2 %1129 }
 0x317   : > { %1230 = vperm.xlu2 %2167, %v3110_v58   ;;  %2166 = vset.pattern.permute.xlu1 %v1210_v20 }
 0x318   : > { %2178 = vset.pattern.permute.xlu0 %v3159_v55 }
 0x31f   : > { %1242 = vperm.xlu2 %2167, %v3125_v12   ;;  %1224 = vperm.xlu1 %2166, %v3112_v9  }
 0x320   : > { %1324 = vperm.xlu0 %2178, %v3114_v19  }
 0x321   : > { %v3178_v26 = vpop.permute.xlu2 %1135 }
 0x327   : > { %2171 = vset.pattern.permute.xlu2 %v1210_v20  ;;  %1236 = vperm.xlu1 %2166, %v3110_v58  }
 0x328   : > { %1384 = vperm.xlu0 %2178, %v3135_v56  }
 0x329   : > { %v3185_v8 = vpop.permute.xlu2 %1148  ;;  %v3196_v51 = vpop.permute.xlu1 %1116 }
 0x32a   : > { %v3194_v61 = vpop.permute.xlu0 %1103 }
 0x32f   : > { %1260 = vperm.xlu2 %2171, %v3120_v13   ;;  %2170 = vset.pattern.permute.xlu1 %v1204_v16 }
 0x330   : > { %2183 = vset.pattern.permute.xlu0 %v3169_v29 }
 0x332   : > { %v3207_v36 = vpop.permute.xlu0 %1155 }
 0x337   : > { %1272 = vperm.xlu2 %2171, %v3135_v56   ;;  %1254 = vperm.xlu1 %2170, %v3120_v13  }
 0x338   : > { %1414 = vperm.xlu0 %2183, %v3114_v19  }
 0x339   : > { %v3192_v34 = vpop.permute.xlu2 %1168  ;;  %v3203_v41 = vpop.permute.xlu1 %1122 }
 0x33f   : > { %2173 = vset.pattern.permute.xlu2 %v1204_v16  ;;  %1266 = vperm.xlu1 %2170, %v3135_v56   ;;  %v1010_v16 = vld [vmem:[%s1009_s13] sm:$0xff] }
 0x340   : > { %1474 = vperm.xlu0 %2183, %v3135_v56   ;;  %v3248_v30 = vmul.f32 %v3224_v18, %v1010_v16 }
 0x341   : > { %v3201_v52 = vpop.permute.xlu2 %1181 }
 0x342   : > { %v3214_v53 = vpop.permute.xlu0 %1109  ;;  %v1524_v0 = vperm.slane %v3248_v30, 0  ;;  %v1540_v45 = vperm.slane %v3248_v30, 1 }
 0x347   : > { %1290 = vperm.xlu2 %2173, %v3144_v22   ;;  %2172 = vset.pattern.permute.xlu1 %v1210_v20  ;;  %v1037_v20 = vperm.slane %v1029_v1, 0  ;;  %v1072_v1 = vmul.f32 1.442695, %v1053_v31 }
 0x348   : > { %2188 = vset.pattern.permute.xlu0 %v3188_v33 }
 0x349   : > { %v1143_v10 = vpop.permute.xlu1 %1142  ;;  %v1056_v28 = vmul.f32 %v1037_v20, %v3067_v43 }
 0x34a   : > { %v3222_v5 = vpop.permute.xlu0 %1187 }
 0x34b   : > { %v1078_v27 = vmul.f32 1.442695, %v1056_v28 }
 0x34d   : > { %2203 = vpow2.f32 %v1078_v27 }
 0x34e   : > { %2205 = vpow2.f32 %v1072_v1 }
 0x34f   : > { %2174 = vset.pattern.permute.xlu2 %v3152_v49  ;;  %1284 = vperm.xlu1 %2172, %v3130_v24  }
 0x350   : > { %1444 = vperm.xlu0 %2188, %v3110_v58  }
 0x351   : > { %v3210_v2 = vpop.permute.xlu2 %1200 }
 0x357   : > { %1318 = vperm.xlu2 %2174, %v3114_v19   ;;  %1296 = vperm.xlu1 %2172, %v3144_v22  }
 0x358   : > { %1504 = vperm.xlu0 %2188, %v3144_v22  }
 0x359   : > { %v3216_v35 = vpop.permute.xlu1 %1161 }
 0x35a   : > { %v3234_v63 = vpop.permute.xlu0 %1248 }
 0x35f   : > { %2176 = vset.pattern.permute.xlu2 %v3159_v55  ;;  %2175 = vset.pattern.permute.xlu1 %v3152_v49 }
 0x361   : > { %v3220_v50 = vpop.permute.xlu2 %1212  ;;  %v3231_v17 = vpop.permute.xlu1 %1174 }
 0x362   : > { %v1299_v47 = vsel %vm478_vm5, %v3214_v53, %v3220_v50  ;;  %v2204_v50 = vpop.eup %2203 }
 0x363   : > { %v1526_v28 = vmul.f32 %v1524_v0, %v1299_v47 }
 0x365   : > { %v3288_v31 = vadd.f32 %v1526_v28, %v1523_v21 }
 0x367   : > { %1336 = vperm.xlu2 %2176, %v3112_v9   ;;  %1330 = vperm.xlu1 %2175, %v3112_v9  }
 0x36a   : > { %v1219_v42 = vpop.permute.xlu0 %1218 }
 0x36b   : > { %v1300_v11 = vsel %vm478_vm5, %v3196_v51, %v1219_v42 }
 0x36c   : > { %v1541_v15 = vmul.f32 %v1540_v45, %v1300_v11 }
 0x36f   : > { %1348 = vperm.xlu2 %2176, %v3110_v58   ;;  %1342 = vperm.xlu1 %2175, %v3110_v58  }
 0x371   : > { %v1231_v39 = vpop.permute.xlu2 %1230  ;;  %v3241_v40 = vpop.permute.xlu1 %1194 }
 0x372   : > { %v1302_v51 = vsel %vm478_vm5, %v3171_v44, %v1231_v39  ;;  %v3271_v59 = vpop.permute.xlu0 %1278  ;;  %v1030_v44 = vrot.slane %v3224_v18, 4  ;;  %v1572_v39 = vperm.slane %v3248_v30, 3 }
 0x377   : > { %2180 = vset.pattern.permute.xlu2 %v3152_v49  ;;  %2179 = vset.pattern.permute.xlu1 %v3159_v55 }
 0x379   : > { %v1243_v57 = vpop.permute.xlu2 %1242 }
 0x37a   : > { %v1304_v3 = vsel %vm478_vm5, %v1143_v10, %v1243_v57  ;;  %v1556_v57 = vperm.slane %v3248_v30, 2 }
 0x37b   : > { %v1573_v27 = vmul.f32 %v1572_v39, %v1304_v3 }
 0x37f   : > { %1366 = vperm.xlu2 %2180, %v3120_v13   ;;  %1360 = vperm.xlu1 %2179, %v3125_v12  }
 0x381   : > { %v1207_v10 = vpop.permute.xlu1 %1206 }
 0x382   : > { %v1298_v54 = vsel %vm478_vm5, %v3194_v61, %v1207_v10  ;;  %v1557_v10 = vmul.f32 %v1556_v57, %v1302_v51 }
 0x383   : > { %v1525_v4 = vmul.f32 %v1524_v0, %v1298_v54  ;;  %v1076_v54 = vmul.f32 1.442695, %v1055_v14  ;;  %v2206_v0 = vpop.eup %2205 }
 0x385   : > { %v3260_v32 = vadd.f32 %v1525_v4, %v1522_v46  ;;  %v1057_v46 = vmul.f32 %v1037_v20, %v3072_v6  ;;  %v1038_v4 = vperm.slane %v1030_v44, 0  ;;  %2207 = vpow2.f32 %v1076_v54 }
 0x386   : > { %v1305_v44 = vsel %vm478_vm5, %v3185_v8, %v3234_v63 }
 0x387   : > { %v1538_v61 = vmul.f32 %v2198_v25, %v3260_v32  ;;  %1378 = vperm.xlu2 %2180, %v3135_v56   ;;  %1372 = vperm.xlu1 %2179, %v3120_v13   ;;  %v3293_v25 = vpop.permute.xlu0 %1354  ;;  %v1080_v1 = vmul.f32 1.442695, %v1057_v46  ;;  %v1058_v21 = vmul.f32 %v1038_v4, %v3067_v43 }
 0x389   : > { %v3273_v16 = vadd.f32 %v1541_v15, %v1538_v61  ;;  %v1261_v7 = vpop.permute.xlu2 %1260  ;;  %v1539_v61 = vmul.f32 %v2206_v0, %v3288_v31  ;;  %2209 = vpow2.f32 %v1080_v1  ;;  %v1082_v54 = vmul.f32 1.442695, %v1058_v21 }
 0x38a   : > { %v3278_v42 = vsel %vm478_vm5, %v3216_v35, %v1261_v7  ;;  %v1031_v35 = vrot.slane %v3224_v18, 5 }
 0x38b   : > { %v1554_v53 = vmul.f32 %v2202_v60, %v3273_v16  ;;  %v2208_v14 = vpop.eup %2207 }
 0x38c   : > { %v1039_v3 = vperm.slane %v1031_v35, 0  ;;  %v1574_v35 = vmul.f32 %v1572_v39, %v1305_v44  ;;  %v1033_v39 = vrot.slane %v3224_v18, 7 }
 0x38d   : > { %v3285_v37 = vadd.f32 %v1557_v10, %v1554_v53 }
 0x38e   : > { %v1061_v7 = vmul.f32 %v1039_v3, %v3072_v6  ;;  %v1060_v63 = vmul.f32 %v1039_v3, %v3067_v43 }
 0x38f   : > { %2182 = vset.pattern.permute.xlu2 %v3159_v55  ;;  %2181 = vset.pattern.permute.xlu1 %v3152_v49  ;;  %v1570_v38 = vmul.f32 %v2204_v50, %v3285_v37  ;;  %v1059_v49 = vmul.f32 %v1038_v4, %v3072_v6  ;;  %v2210_v50 = vpop.eup %2209 }
 0x390   : > { %v1088_v28 = vmul.f32 1.442695, %v1061_v7  ;;  %v1041_v7 = vperm.slane %v1033_v39, 0 }
 0x391   : > { %v1273_v11 = vpop.permute.xlu2 %1272  ;;  %v1225_v20 = vpop.permute.xlu1 %1224  ;;  %v3295_v23 = vadd.f32 %v1573_v27, %v1570_v38  ;;  %v1084_v51 = vmul.f32 1.442695, %v1059_v49  ;;  %v1032_v38 = vrot.slane %v3224_v18, 6 }
 0x392   : > { %v1309_v15 = vsel %vm478_vm5, %v3231_v17, %v1273_v11  ;;  %v1301_v55 = vsel %vm478_vm5, %v3203_v41, %v1225_v20  ;;  %v3312_v53 = vpop.permute.xlu0 %1324  ;;  %v1604_v20 = vperm.slane %v3248_v30, 5 }
 0x393   : > { %v1542_v60 = vmul.f32 %v1540_v45, %v1301_v55  ;;  %2211 = vpow2.f32 %v1084_v51  ;;  %v1040_v49 = vperm.slane %v1032_v38, 0  ;;  %v1086_v51 = vmul.f32 1.442695, %v1060_v63 }
 0x394   : > { %2213 = vpow2.f32 %v1088_v28  ;;  %v1064_v28 = vmul.f32 %v1041_v7, %v3067_v43 }
 0x395   : > { %v3303_v47 = vadd.f32 %v1542_v60, %v1539_v61  ;;  %2215 = vpow2.f32 %v1082_v54  ;;  %v1063_v38 = vmul.f32 %v1040_v49, %v3072_v6 }
 0x396   : > { %2217 = vpow2.f32 %v1086_v51 }
 0x397   : > { %1396 = vperm.xlu2 %2182, %v3130_v24   ;;  %1390 = vperm.xlu1 %2181, %v3130_v24   ;;  %v1555_v45 = vmul.f32 %v2208_v14, %v3303_v47  ;;  %v1606_v14 = vmul.f32 %v1604_v20, %v1309_v15 }
 0x399   : > { %v1237_v17 = vpop.permute.xlu1 %1236 }
 0x39a   : > { %v1303_v41 = vsel %vm478_vm5, %v3178_v26, %v1237_v17  ;;  %v1588_v26 = vperm.slane %v3248_v30, 4  ;;  %v3333_v61 = vpop.permute.xlu0 %1384 }
 0x39b   : > { %v1558_v10 = vmul.f32 %v1556_v57, %v1303_v41  ;;  %v2212_v57 = vpop.eup %2211 }
 0x39c   : > { %v1590_v11 = vmul.f32 %v1588_v26, %v3278_v42  ;;  %v2214_v55 = vpop.eup %2213 }
 0x39d   : > { %v3317_v46 = vadd.f32 %v1558_v10, %v1555_v45  ;;  %v2216_v42 = vpop.eup %2215 }
 0x39e   : > { %v1586_v45 = vmul.f32 %v2216_v42, %v3295_v23  ;;  %v2218_v54 = vpop.eup %2217 }
 0x39f   : > { %v1571_v27 = vmul.f32 %v2210_v50, %v3317_v46  ;;  %1408 = vperm.xlu2 %2182, %v3144_v22   ;;  %1402 = vperm.xlu1 %2181, %v3144_v22   ;;  %v1094_v50 = vmul.f32 1.442695, %v1064_v28 }
 0x3a1   : > { %v3324_v0 = vadd.f32 %v1574_v35, %v1571_v27  ;;  %v1291_v4 = vpop.permute.xlu2 %1290 }
 0x3a2   : > { %v1312_v8 = vsel %vm478_vm5, %v3241_v40, %v1291_v4  ;;  %v1062_v40 = vmul.f32 %v1040_v49, %v3067_v43  ;;  %v1636_v49 = vperm.slane %v3248_v30, 7  ;;  %v3473_v43 = vld [vmem:[#allocation4 + $0x30] sm:$0xff] (%p995_p0) }
 0x3a3   : > { %v1587_v1 = vmul.f32 %v2212_v57, %v3324_v0 }
 0x3a4   : > { %v1090_v21 = vmul.f32 1.442695, %v1062_v40  ;;  %v1065_v40 = vmul.f32 %v1041_v7, %v3072_v6  ;;  %v1708_v6 = vsub.f32 (%p995_p0), 0.0, %v3473_v43 }
 0x3a5   : > { %v3335_v60 = vadd.f32 %v1590_v11, %v1587_v1  ;;  %v1310_v11 = vsel %vm478_vm5, %v3201_v52, %v3271_v59 }
 0x3a6   : > { %2219 = vpow2.f32 %v1090_v21 }
 0x3a7   : > { %2185 = vset.pattern.permute.xlu2 %v3169_v29  ;;  %2184 = vset.pattern.permute.xlu1 %v3188_v33  ;;  %v1603_v18 = vmul.f32 %v2214_v55, %v3335_v60  ;;  %2221 = vpow2.f32 %v1094_v50 }
 0x3a9   : > { %v1255_v3 = vpop.permute.xlu1 %1254  ;;  %v3341_v17 = vadd.f32 %v1606_v14, %v1603_v18  ;;  %v1637_v14 = vmul.f32 %v1636_v49, %v1312_v8 }
 0x3aa   : > { %v1306_v41 = vsel %vm478_vm5, %v3207_v36, %v1255_v3  ;;  %v1415_v44 = vpop.permute.xlu0 %1414 }
 0x3ab   : > { %v1589_v15 = vmul.f32 %v1588_v26, %v1306_v41  ;;  %v1620_v26 = vperm.slane %v3248_v30, 6  ;;  %v1096_v30 = vmul.f32 1.442695, %v1065_v40 }
 0x3ac   : > { %v2220_v39 = vpop.eup %2219 }
 0x3ad   : > { %v3347_v10 = vadd.f32 %v1589_v15, %v1586_v45  ;;  %v1621_v55 = vmul.f32 %v1620_v26, %v1310_v11 }
 0x3af   : > { %1426 = vperm.xlu2 %2185, %v3112_v9   ;;  %1420 = vperm.xlu1 %2184, %v3114_v19   ;;  %v1602_v19 = vmul.f32 %v2218_v54, %v3347_v10 }
 0x3b1   : > { %v1319_v35 = vpop.permute.xlu2 %1318  ;;  %v1267_v27 = vpop.permute.xlu1 %1266 }
 0x3b2   : > { %v1308_v36 = vsel %vm478_vm5, %v3192_v34, %v1267_v27  ;;  %v1506_v57 = vsel %vm478_vm5, %v1319_v35, %v1415_v44  ;;  %v1092_v34 = vmul.f32 1.442695, %v1063_v38  ;;  %v3373_v59 = vpop.permute.xlu0 %1474 }
 0x3b3   : > { %v1605_v4 = vmul.f32 %v1604_v20, %v1308_v36  ;;  %v3357_v63 = vmul.f32 %v3260_v32, %v1506_v57  ;;  %v2222_v20 = vpop.eup %2221 }
 0x3b4   : > { %2223 = vpow2.f32 %v1092_v34 }
 0x3b5   : > { %v3363_v1 = vadd.f32 %v1605_v4, %v1602_v19  ;;  %2225 = vpow2.f32 %v1096_v30 }
 0x3b7   : > { %1438 = vperm.xlu2 %2185, %v3110_v58   ;;  %1432 = vperm.xlu1 %2184, %v3112_v9   ;;  %v1618_v32 = vmul.f32 %v2220_v39, %v3363_v1 }
 0x3b9   : > { %v3369_v51 = vadd.f32 %v1621_v55, %v1618_v32 }
 0x3ba   : > { %v2224_v58 = vpop.eup %2223 }
 0x3bb   : > { %v1634_v52 = vmul.f32 %v2222_v20, %v3369_v51  ;;  %v1619_v8 = vmul.f32 %v2224_v58, %v3341_v17  ;;  %v2226_v21 = vpop.eup %2225 }
 0x3bd   : > { %v3375_v15 = vadd.f32 %v1637_v14, %v1634_v52  }
 0x3bf   : > { %2187 = vset.pattern.permute.xlu2 %v3188_v33  ;;  %2186 = vset.pattern.permute.xlu1 %v3169_v29 }
 0x3c1   : > { %v1337_v9 = vpop.permute.xlu2 %1336  ;;  %v1285_v18 = vpop.permute.xlu1 %1284 }
 0x3c2   : > { %v1311_v42 = vsel %vm478_vm5, %v3222_v5, %v1285_v18  ;;  %v1445_v41 = vpop.permute.xlu0 %1444 }
 0x3c3   : > { %v1622_v7 = vmul.f32 %v1620_v26, %v1311_v42 }
 0x3c5   : > { %v3382_v3 = vadd.f32 %v1622_v7, %v1619_v8 }
 0x3c7   : > { %1456 = vperm.xlu2 %2187, %v3125_v12   ;;  %1450 = vperm.xlu1 %2186, %v3125_v12   ;;  %v1635_v35 = vmul.f32 %v2226_v21, %v3382_v3 }
 0x3c9   : > { %v1349_v28 = vpop.permute.xlu2 %1348  ;;  %v1297_v45 = vpop.permute.xlu1 %1296 }
 0x3ca   : > { %v1313_v50 = vsel %vm478_vm5, %v3210_v2, %v1297_v45  ;;  %v1511_v44 = vsel %vm478_vm5, %v1349_v28, %v1445_v41 }
 0x3cb   : > { %v1638_v5 = vmul.f32 %v1636_v49, %v1313_v50  ;;  %v1562_v54 = vmul.f32 %v3317_v46, %v1511_v44 }
 0x3cd   : > { %v3391_v38 = vadd.f32 %v1638_v5, %v1635_v35  }
 0x3cf   : > { %1468 = vperm.xlu2 %2187, %v3120_v13   ;;  %1462 = vperm.xlu1 %2186, %v3120_v13  }
 0x3d7   : > { %2190 = vset.pattern.permute.xlu2 %v3169_v29  ;;  %2189 = vset.pattern.permute.xlu1 %v3188_v33 }
 0x3d9   : > { %v3399_v12 = vpop.permute.xlu2 %1366  ;;  %v1331_v2 = vpop.permute.xlu1 %1330 }
 0x3df   : > { %1486 = vperm.xlu2 %2190, %v3130_v24   ;;  %1480 = vperm.xlu1 %2189, %v3135_v56  }
 0x3e1   : > { %v3403_v46 = vpop.permute.xlu2 %1378  ;;  %v1343_v27 = vpop.permute.xlu1 %1342 }
 0x3e7   : > { %1498 = vperm.xlu2 %2190, %v3144_v22   ;;  %1492 = vperm.xlu1 %2189, %v3130_v24  }
 0x3f1   : > { %v3405_v36 = vpop.permute.xlu2 %1396  ;;  %v1361_v13 = vpop.permute.xlu1 %1360 }
 0x3f9   : > { %v1409_v29 = vpop.permute.xlu2 %1408  ;;  %v1373_v57 = vpop.permute.xlu1 %1372 }
 0x409   : > { %v1427_v33 = vpop.permute.xlu2 %1426  ;;  %v3409_v4 = vpop.permute.xlu1 %1390 }
 0x40a   : > { %v1508_v26 = vsel %vm478_vm5, %v1331_v2, %v1427_v33 }
 0x40b   : > { %v1545_v56 = vmul.f32 %v3273_v16, %v1508_v26  ;;  %v1505_v26 = vpop.permute.xlu0 %1504 }
 0x411   : > { %v1439_v19 = vpop.permute.xlu2 %1438  ;;  %v1403_v11 = vpop.permute.xlu1 %1402 }
 0x412   : > { %v1510_v22 = vsel %vm478_vm5, %v1343_v27, %v1439_v19 }
 0x413   : > { %v1561_v24 = vmul.f32 %v3285_v37, %v1510_v22  ;;  %v1521_v22 = vsel %vm478_vm5, %v1409_v29, %v1505_v26 }
 0x415   : > { %v1563_v39 = vadd.f32 %v1562_v54, %v1561_v24 }
 0x417   : > { %v1564_v14 = vrot.slane %v1563_v39, 4 }
 0x419   : > { %v1565_v37 = vadd.f32 %v1564_v14, %v1563_v39 }
 0x41b   : > { %v1566_v41 = vrot.slane %v1565_v37, 2 }
 0x41d   : > { %v1567_v45 = vadd.f32 %v1566_v41, %v1565_v37 }
 0x41f   : > { %v1568_v44 = vrot.slane %v1567_v45, 1 }
 0x421   : > { %v1457_v34 = vpop.permute.xlu2 %1456  ;;  %v1421_v55 = vpop.permute.xlu1 %1420 }
 0x422   : > { %v1513_v49 = vsel %vm478_vm5, %v1361_v13, %v1457_v34  ;;  %v1507_v32 = vsel %vm478_vm5, %v3312_v53, %v1421_v55 }
 0x423   : > { %v1578_v20 = vmul.f32 %v3324_v0, %v1513_v49  ;;  %v1530_v16 = vmul.f32 %v3288_v31, %v1507_v32  ;;  %v1642_v32 = vmul.f32 %v3391_v38, %v1521_v22  ;;  %v3478_v38 = vld [vmem:[#allocation4 + $0x18] sm:$0xff] (%p995_p0) }
 0x425   : > { %v1531_v40 = vadd.f32 %v1530_v16, %v3357_v63 }
 0x427   : > { %v1532_v52 = vrot.slane %v1531_v40, 4 }
 0x429   : > { %v1533_v30 = vadd.f32 %v1532_v52, %v1531_v40  ;;  %v1433_v58 = vpop.permute.xlu1 %1432  ;;  %v1469_v28 = vpop.permute.xlu2 %1468 }
 0x42a   : > { %v1509_v18 = vsel %vm478_vm5, %v1337_v9, %v1433_v58  ;;  %v1569_v9 = vadd.f32 %v1568_v44, %v1567_v45  ;;  %v1515_v39 = vsel %vm478_vm5, %v1373_v57, %v1469_v28 }
 0x42b   : > { %v1546_v42 = vmul.f32 %v3303_v47, %v1509_v18  ;;  %v1534_v8 = vrot.slane %v1533_v30, 2 }
 0x42d   : > { %v1547_v7 = vadd.f32 %v1546_v42, %v1545_v56  ;;  %v1535_v53 = vadd.f32 %v1534_v8, %v1533_v30 }
 0x42f   : > { %v1548_v21 = vrot.slane %v1547_v7, 4  ;;  %v1536_v50 = vrot.slane %v1535_v53, 1 }
 0x431   : > { %v1549_v0 = vadd.f32 %v1548_v21, %v1547_v7  ;;  %v1537_v54 = vadd.f32 %v1536_v50, %v1535_v53 }
 0x433   : > { %v1550_v31 = vrot.slane %v1549_v0, 2 }
 0x435   : > { %v1551_v63 = vadd.f32 %v1550_v31, %v1549_v0 }
 0x437   : > { %v1552_v5 = vrot.slane %v1551_v63, 1 }
 0x439   : > { %v1553_v35 = vadd.f32 %v1552_v5, %v1551_v63  ;;  %v1487_v2 = vpop.permute.xlu2 %1486  ;;  %v1451_v27 = vpop.permute.xlu1 %1450 }
 0x43a   : > { %v1512_v47 = vsel %vm478_vm5, %v3293_v25, %v1451_v27  ;;  %v1518_v50 = vsel %vm478_vm5, %v3409_v4, %v1487_v2 }
 0x43b   : > { %v1650_v13 = vsel %vm643_vm8, %v1537_v54, %v1553_v35  ;;  %v1577_v33 = vmul.f32 %v3295_v23, %v1512_v47  ;;  %v1594_v23 = vmul.f32 %v3335_v60, %v1515_v39  ;;  %v1516_v60 = vsel %vm478_vm5, %v3403_v46, %v3373_v59  ;;  %v1890_v39 = vld [vmem:[%s3764_s8 + $0x70] sm:$0xff] (%p995_p0) }
 0x43c   : > { %v1651_v56 = vsel %vm584_vm7, %v1650_v13, %v1569_v9  ;;  %v1609_v21 = vmul.f32 %v3363_v1, %v1516_v60  ;;  %v1625_v5 = vmul.f32 %v3369_v51, %v1518_v50  ;;  %v1881_v60 = vld [vmem:[%s3764_s8 + $0x28] sm:$0xff] (%p995_p0) }
 0x43d   : > { %v1579_v19 = vadd.f32 %v1578_v20, %v1577_v33 }
 0x43f   : > { %v1580_v24 = vrot.slane %v1579_v19, 4 }
 0x441   : > { %v1581_v34 = vadd.f32 %v1580_v24, %v1579_v19  ;;  %v1499_v55 = vpop.permute.xlu2 %1498  ;;  %v1463_v49 = vpop.permute.xlu1 %1462  ;;  %v1891_v24 = vld [vmem:[%s3764_s8 + $0x78] sm:$0xff] (%p995_p0) }
 0x442   : > { %v1520_v25 = vsel %vm478_vm5, %v1403_v11, %v1499_v55  ;;  %v1514_v16 = vsel %vm478_vm5, %v3399_v12, %v1463_v49  ;;  %1948 = vmatpush.msra.mxu3 (%p995_p0), %v1891_v24  ;;  %v3480_v55 = vld [vmem:[#allocation4 + $0x10] sm:$0xff] (%p995_p0) }
 0x443   : > { %v1582_v40 = vrot.slane %v1581_v34, 2  ;;  %v1641_v20 = vmul.f32 %v3375_v15, %v1520_v25  ;;  %v1593_v29 = vmul.f32 %v3347_v10, %v1514_v16  ;;  %v1888_v15 = vld [vmem:[%s3764_s8 + $0x60] sm:$0xff] (%p995_p0)  ;;  %v1886_v49 = vld [vmem:[%s3764_s8 + $0x50] sm:$0xff] (%p995_p0)  ;;  %v1710_v25 = vsub.f32 (%p995_p0), 0.0, %v3478_v38 }
 0x444   :  { %1949 = vmatpush.msra.mxu3 (%p995_p0), %v1890_v39  ;;  %v1711_v16 = vsub.f32 (%p995_p0), 0.0, %v3480_v55 }
 0x445   : > { %v1583_v14 = vadd.f32 %v1582_v40, %v1581_v34  ;;  %v1643_v52 = vadd.f32 %v1642_v32, %v1641_v20  ;;  %v1595_v57 = vadd.f32 %v1594_v23, %v1593_v29  ;;  %v1889_v34 = vld [vmem:[%s3764_s8 + $0x68] sm:$0xff] (%p995_p0)  ;;  %v1709_v32 = vsub.f32 (%p995_p0), 0.0, %v3476_v62 }
 0x446   :  { %1950 = vmatpush.msra.mxu3 (%p995_p0), %v1889_v34  ;;  %v3488_v23 = vld [vmem:[#allocation4 + $0x8] sm:$0xff] (%p995_p0)  ;;  %v1716_v40 = vmul.f32 (%p995_p0), 1.442695, %v1708_v6  ;;  %v1675_v34 = vld [vmem:[#allocation3 + $0x18] sm:$0xff] (%p995_p0) }
 0x447   : > { %v1584_v30 = vrot.slane %v1583_v14, 1  ;;  %v1596_v58 = vrot.slane %v1595_v57, 4  ;;  %v1644_v45 = vrot.slane %v1643_v52, 4  ;;  %v1885_v20 = vld [vmem:[%s3764_s8 + $0x48] sm:$0xff] (%p995_p0)  ;;  %v1718_v29 = vmul.f32 (%p995_p0), 1.442695, %v1709_v32 }
 0x448   :  { %1951 = vmatpush.msra.mxu3 (%p995_p0), %v1888_v15  ;;  %2228 = vpow2.f32 (%p995_p0), %v1716_v40  ;;  %v1902_v40 = vld [vmem:[%s3756_s0 + $0x50] sm:$0xff] (%p995_p0) }
 0x449   : > { %v1585_v37 = vadd.f32 %v1584_v30, %v1583_v14  ;;  %v1597_v18 = vadd.f32 %v1596_v58, %v1595_v57  ;;  %v1645_v59 = vadd.f32 %v1644_v45, %v1643_v52  ;;  %v1720_v14 = vmul.f32 (%p995_p0), 1.442695, %v1710_v25  ;;  %v1884_v30 = vld [vmem:[%s3764_s8 + $0x40] sm:$0xff] (%p995_p0)  ;;  %v1883_v58 = vld [vmem:[%s3764_s8 + $0x38] sm:$0xff] (%p995_p0)  ;;  %1920 = vrot.lane.b32.xlu1 (%p995_p0), %v1902_v40, %s2312_s12 }
 0x44a   :  { %1952 = vmatpush.msra.mxu3 (%p995_p0), %v1887_v48  ;;  %v1722_v52 = vmul.f32 (%p995_p0), 1.442695, %v1711_v16  ;;  %v1712_v57 = vsub.f32 (%p995_p0), 0.0, %v3488_v23  ;;  %2230 = vpow2.f32 (%p995_p0), %v1718_v29 }
 0x44b   : > { %v1653_v42 = vsel %vm1652_vm6, %v1651_v56, %v1585_v37  ;;  %v1598_v11 = vrot.slane %v1597_v18, 2  ;;  %2232 = vpow2.f32 (%p995_p0), %v1720_v14 }
 0x44c   :  { %1953 = vmatpush.msra.mxu3 (%p995_p0), %v1886_v49  ;;  %2234 = vpow2.f32 (%p995_p0), %v1722_v52  ;;  %v1724_v37 = vmul.f32 (%p995_p0), 1.442695, %v1712_v57 }
 0x44d   : > { %v1599_v8 = vadd.f32 %v1598_v11, %v1597_v18  ;;  %v1882_v18 = vld [vmem:[%s3764_s8 + $0x30] sm:$0xff] (%p995_p0) }
 0x44e   :  { %1954 = vmatpush.msra.mxu3 (%p995_p0), %v1885_v20  ;;  %v2229_v11 = vpop.eup (%p995_p0), %2228  ;;  %2236 = vpow2.f32 (%p995_p0), %v1724_v37  ;;  %v1673_v20 = vld [vmem:[#allocation3 + $0x8] sm:$0xff] (%p995_p0) }
 0x44f   : > { %v1600_v7 = vrot.slane %v1599_v8, 1 }
 0x450   :  { %1955 = vmatpush.msra.mxu3 (%p995_p0), %v1884_v30 }
 0x451   : > { %v1601_v12 = vadd.f32 %v1600_v7, %v1599_v8  ;;  %v1481_v41 = vpop.permute.xlu1 %1480  ;;  %v1900_v8 = vld [vmem:[%s3756_s0 + $0x40] sm:$0xff] (%p995_p0)  ;;  %v2231_v7 = vpop.eup (%p995_p0), %2230 }
 0x452   : > { %v1517_v10 = vsel %vm478_vm5, %v3333_v61, %v1481_v41  ;;  %1956 = vmatpush.msra.mxu3 (%p995_p0), %v1883_v58  ;;  %1916 = vrot.lane.b32.xlu0 (%p995_p0), %v1900_v8, %s2312_s12  ;;  %v2233_v41 = vpop.eup (%p995_p0), %2232 }
 0x453   : > { %v1655_v53 = vsel %vm1654_vm9, %v1653_v42, %v1601_v12  ;;  %v1610_v28 = vmul.f32 %v3341_v17, %v1517_v10  ;;  %v1646_v17 = vrot.slane %v1645_v59, 2  ;;  %v3503_v42 = vld [vmem:[#allocation4 + $0x20] sm:$0xff] (%p995_p0)  ;;  %v1732_v12 = vadd.f32 (%p995_p0), 1.0, %v2229_v11 }
 0x454   :  { %1957 = vmatpush.msra.mxu3 (%p995_p0), %v1882_v18  ;;  %v3512_v10 = vadd.f32 (%p995_p0), 1.0, %v2231_v7  ;;  %v3522_v45 = vadd.f32 (%p995_p0), 1.0, %v2233_v41 }
 0x455   : > { %v1611_v0 = vadd.f32 %v1610_v28, %v1609_v21  ;;  %v1647_v2 = vadd.f32 %v1646_v17, %v1645_v59  ;;  %v1713_v21 = vsub.f32 (%p995_p0), 0.0, %v3503_v42  ;;  %v1880_v28 = vld [vmem:[%s3764_s8 + $0x20] sm:$0xff] (%p995_p0)  ;;  %2238 = vrcp.f32 (%p995_p0), %v1732_v12 }
 0x456   :  { %1958 = vmatpush.msra.mxu3 (%p995_p0), %v1881_v60  ;;  %2240 = vrcp.f32 (%p995_p0), %v3512_v10  ;;  %v1672_v59 = vld [vmem:[#allocation3] sm:$0xff] (%p995_p0)  ;;  %vm1745_vm7 = vweird.f32 (%p995_p0), %v1732_v12  ;;  %vm1760_vm13 = vweird.f32 (%p995_p0), %v3512_v10  ;;  %vm1775_vm4 = vweird.f32 (%p995_p0), %v3522_v45 }
 0x457   : > { %v1612_v31 = vrot.slane %v1611_v0, 4  ;;  %v1648_v56 = vrot.slane %v1647_v2, 1  ;;  %2242 = vrcp.f32 (%p995_p0), %v3522_v45  ;;  %v1781_v41 = vand.u32 (%p995_p0), 2147483648, %v3522_v45 }
 0x458   :  { %1959 = vmatpush.msra.mxu3 (%p995_p0), %v1880_v28 }
 0x459   : > { %v1613_v63 = vadd.f32 %v1612_v31, %v1611_v0  ;;  %v1493_v44 = vpop.permute.xlu1 %1492  ;;  %v1649_v19 = vadd.f32 %v1648_v56, %v1647_v2  ;;  %v1879_v0 = vld [vmem:[%s3764_s8 + $0x18] sm:$0xff] (%p995_p0)  ;;  %v3527_v31 = vld [vmem:[%s3763_s7] ss:$0 sm:$0xff] (%p995_p0)  ;;  %v3548_v2 = vld [vmem:[#allocation4 + $0x28] sm:$0xff] (%p995_p0) }
 0x45a   : > { %v1519_v46 = vsel %vm478_vm5, %v3405_v36, %v1493_v44  ;;  %v1878_v44 = vld [vmem:[%s3764_s8 + $0x10] sm:$0xff] (%p995_p0)  ;;  %1960 = vmatpush.msra.mxu3 (%p995_p0), %v1879_v0  ;;  %v1714_v24 = vsub.f32 (%p995_p0), 0.0, %v3548_v2  ;;  %v1685_v8 = vmul.f32 (%p995_p0), %v3527_v31, %v1673_v20 }
 0x45b   : > { %v1614_v61 = vrot.slane %v1613_v63, 2  ;;  %v1626_v1 = vmul.f32 %v3382_v3, %v1519_v46 }
 0x45c   :  { %1961 = vmatpush.msra.mxu3 (%p995_p0), %v1878_v44  ;;  %v1728_v58 = vmul.f32 (%p995_p0), 1.442695, %v1714_v24 }
 0x45d   : > { %v1615_v54 = vadd.f32 %v1614_v61, %v1613_v63  ;;  %v1627_v35 = vadd.f32 %v1626_v1, %v1625_v5  ;;  %v1726_v63 = vmul.f32 (%p995_p0), 1.442695, %v1713_v21  ;;  %v1901_v5 = vld [vmem:[%s3756_s0 + $0x48] sm:$0xff] (%p995_p0) }
 0x45e   :  { %v1877_v1 = vld [vmem:[%s3764_s8 + $0x8] sm:$0xff] (%p995_p0)  ;;  %1918 = vrot.lane.b32.xlu0 (%p995_p0), %v1901_v5, %s2312_s12  ;;  %v3607_v5 = vld [vmem:[#allocation4 + $0x38] sm:$0xff] (%p995_p0) }
 0x45f   : > { %v1616_v27 = vrot.slane %v1615_v54, 1  ;;  %v1628_v9 = vrot.slane %v1627_v35, 4  ;;  %1962 = vmatpush.msra.mxu3 (%p995_p0), %v1877_v1 }
 0x461   : > { %v1617_v47 = vadd.f32 %v1616_v27, %v1615_v54  ;;  %v1629_v4 = vadd.f32 %v1628_v9, %v1627_v35  ;;  %v1684_v35 = vmul.f32 (%p995_p0), %v3527_v31, %v1672_v59  ;;  %v1876_v27 = vld [vmem:[%s3764_s8] sm:$0xff] (%p995_p0)  ;;  %v1749_v9 = vand.u32 (%p995_p0), 2147483647, %v1732_v12  ;;  %v1674_v59 = vld [vmem:[#allocation3 + $0x10] sm:$0xff] (%p995_p0)  ;;  %s2001_s8 = sshll.u32 (%p995_p0), %s2313_s24, 4  ;;  %s2002_s8 = int_to_ptr.vmem [resolvable:$true] %s2001_s8 }
 0x462   :  { %1963 = vmatpush.msra.mxu3 (%p995_p0), %v1876_v27  ;;  %v1715_v27 = vsub.f32 (%p995_p0), 0.0, %v3607_v5 }
 0x463   : > { %v1657_v13 = vsel %vm1656_vm10, %v1655_v53, %v1617_v47  ;;  %v1630_v33 = vrot.slane %v1629_v4, 2  ;;  %v2235_v53 = vpop.eup (%p995_p0), %2234  ;;  %v1751_v47 = vand.u32 (%p995_p0), 2147483648, %v1732_v12  ;;  %vm1750_vm1 = vcmp.eq.f32.partialorder (%p995_p0), %v1749_v9, 8.507059e+37 }
 0x464   :  { %v3529_v50 = vadd.f32 (%p995_p0), 1.0, %v2235_v53  ;;  %v2237_v46 = vpop.eup (%p995_p0), %2236 }
 0x465   : > { %v1631_v26 = vadd.f32 %v1630_v33, %v1629_v4  ;;  %v2239_v61 = vpop.eup (%p995_p0), %2238  ;;  %v1764_v33 = vand.u32 (%p995_p0), 2147483647, %v3512_v10  ;;  %v1752_v15 = vor.u32 (%p995_p0), 1.1754944e-38, %v1751_v47 }
 0x466   :  { %2244 = vrcp.f32 (%p995_p0), %v3529_v50  ;;  %v2241_v54 = vpop.eup (%p995_p0), %2240  ;;  %v1741_v17 = vmul.f32 (%p995_p0), %v2239_v61, %v1732_v12  ;;  %vm1746_vm8 = vweird.f32 (%p995_p0), %v2239_v61  ;;  %v1779_v12 = vand.u32 (%p995_p0), 2147483647, %v3522_v45 }
 0x467   : > { %v1632_v36 = vrot.slane %v1631_v26, 1  ;;  %2246 = vpow2.f32 (%p995_p0), %v1726_v63  ;;  %v1756_v4 = vmul.f32 (%p995_p0), %v2241_v54, %v3512_v10  ;;  %vm1761_vm14 = vweird.f32 (%p995_p0), %v2241_v54  ;;  %vm3563_vm15 = vmor (%p995_p0), %vm1745_vm7, %vm1746_vm8 }
 0x468   :  { %vm3570_vm2 = vmor (%p995_p0), %vm1760_vm13, %vm1761_vm14  ;;  %vm1765_vm3 = vcmp.eq.f32.partialorder (%p995_p0), %v1764_v33, 8.507059e+37  ;;  %vm1780_vm10 = vcmp.eq.f32.partialorder (%p995_p0), %v1779_v12, 8.507059e+37 }
 0x469   : > { %v1633_v51 = vadd.f32 %v1632_v36, %v1631_v26  ;;  %997 = sbr.rel (!%p995_p0) target bundleno = 686 (0x2ae), region = 66  ;;  %v3552_v26 = vpop.eup (%p995_p0), %2242  ;;  %v1757_v36 = vsub.f32 (%p995_p0), 1.0, %v1756_v4  ;;  %v1796_v4 = vand.u32 (%p995_p0), 2147483648, %v3529_v50 }
 0x46a   :  { %vm1776_vm6 = vweird.f32 (%p995_p0), %v3552_v26 }
 0x46b   : > { %v1659_v3 = vsel %vm1658_vm11, %v1657_v13, %v1633_v51  ;;  %v1742_v13 = vsub.f32 (%p995_p0), 1.0, %v1741_v17  ;;  %v1766_v51 = vand.u32 (%p995_p0), 2147483648, %v3512_v10  ;;  %v1758_v48 = vmul.f32 (%p995_p0), %v2241_v54, %v1757_v36  ;;  %vm3597_vm9 = vmor (%p995_p0), %vm1775_vm4, %vm1776_vm6 }
 0x46c   : > { %v1661_v22 = vsel %vm1660_vm12, %v1659_v3, %v1649_v19  ;;  %v3555_v19 = vadd.f32 (%p995_p0), 1.0, %v2237_v46  ;;  %v3560_v39 = vpop.eup (%p995_p0), %2244  ;;  %v1782_v46 = vor.u32 (%p995_p0), 1.1754944e-38, %v1781_v41  ;;  %vm1790_vm11 = vweird.f32 (%p995_p0), %v3529_v50 }
 0x46d   : > { %1663 = vst [vmem:[%s1662_s14] sm:$0xff] %v1661_v22  ;;  %v1743_v3 = vmul.f32 (%p995_p0), %v2239_v61, %v1742_v13  ;;  %v1771_v22 = vmul.f32 (%p995_p0), %v3552_v26, %v3522_v45  ;;  %v2247_v6 = vpop.eup (%p995_p0), %2246  ;;  %v1759_v29 = vadd.f32 (%p995_p0), %v2241_v54, %v1758_v48  ;;  %v1767_v14 = vor.u32 (%p995_p0), 1.1754944e-38, %v1766_v51  ;;  %v1903_v45 = vld [vmem:[%s3756_s0 + $0x58] sm:$0xff] (%p995_p0) }
 0x46e   :  { %2248 = vrcp.f32 %v3555_v19  ;;  %v1786_v30 = vmul.f32 %v3560_v39, %v3529_v50  ;;  %v3592_v10 = vadd.f32 1.0, %v2247_v6  ;;  %1922 = vrot.lane.b32.xlu1 %v1903_v45, %s2312_s12  ;;  %vm1791_vm12 = vweird.f32 %v3560_v39  ;;  %v1904_v45 = vld [vmem:[%s3756_s0 + $0x60] sm:$0xff] }
 0x46f   :  { %v1744_v32 = vadd.f32 %v2239_v61, %v1743_v3  ;;  %v1772_v16 = vsub.f32 1.0, %v1771_v22  ;;  %v1763_v18 = vsel %vm3570_vm2, %v2241_v54, %v1759_v29  ;;  %2250 = vpow2.f32 %v1728_v58  ;;  %vm3626_vm7 = vmor %vm1790_vm11, %vm1791_vm12  ;;  %1924 = vrot.lane.b32.xlu2 %v1904_v45, %s2312_s12  ;;  %v1678_v3 = vld [vmem:[#allocation3 + $0x30] sm:$0xff] }
 0x470   :  { %v1768_v60 = vsel %vm1765_vm3, %v1767_v14, %v1763_v18  ;;  %v1787_v28 = vsub.f32 1.0, %v1786_v30  ;;  %2252 = vrcp.f32 %v3592_v10  ;;  %v1686_v54 = vmul.f32 %v3527_v31, %v1674_v59  ;;  %v1906_v59 = vld [vmem:[%s3756_s0 + $0x70] sm:$0xff] }
 0x471   :  { %v1748_v52 = vsel %vm3563_vm15, %v2239_v61, %v1744_v32  ;;  %v1773_v57 = vmul.f32 %v3552_v26, %v1772_v16  ;;  %v1861_v44 = vmul.f32 %v1768_v60, %v3476_v62  ;;  %v1730_v36 = vmul.f32 1.442695, %v1715_v27  ;;  %1928 = vrot.lane.b32.xlu0 %v1906_v59, %s2312_s12  ;;  %v1896_v59 = vld [vmem:[%s3756_s0 + $0x20] sm:$0xff] }
 0x472   :  { %v1753_v37 = vsel %vm1750_vm1, %v1752_v15, %v1748_v52  ;;  %v1788_v1 = vmul.f32 %v3560_v39, %v1787_v28  ;;  %v1797_v15 = vor.u32 1.1754944e-38, %v1796_v4  ;;  %v1687_v32 = vmul.f32 %v3527_v31, %v1675_v34 }
 0x473   :  { %v1860_v11 = vmul.f32 %v1753_v37, %v3473_v43  ;;  %v1774_v53 = vadd.f32 %v3552_v26, %v1773_v57  ;;  %2254 = vpow2.f32 %v1730_v36  ;;  %vm1805_vm13 = vweird.f32 %v3555_v19  ;;  %v1676_v37 = vld [vmem:[#allocation3 + $0x20] sm:$0xff] }
 0x474   :  { %v1664_v56 = vld [vmem:[#allocation5] sm:$0xff]  ;;  %v1665_v7 = vld [vmem:[#allocation5 + $0x8] sm:$0xff]  ;;  %v3595_v43 = vpop.eup %2248  ;;  %v1666_v9 = vld [vmem:[#allocation5 + $0x10] sm:$0xff]  ;;  %v1789_v33 = vadd.f32 %v3560_v39, %v1788_v1  ;;  %v1811_v16 = vand.u32 2147483648, %v3555_v19  ;;  %v1809_v20 = vand.u32 2147483647, %v3555_v19  ;;  %v1688_v60 = vmul.f32 %v3527_v31, %v1676_v37 }
 0x475   :  { %v1692_v49 = vadd.f32 %v1684_v35, %v1664_v56  ;;  %v1693_v63 = vadd.f32 %v1685_v8, %v1665_v7  ;;  %v1778_v61 = vsel %vm3597_vm9, %v3552_v26, %v1774_v53  ;;  %v1801_v62 = vmul.f32 %v3595_v43, %v3555_v19  ;;  %v2251_v35 = vpop.eup %2250 }
 0x476   :  { %v1783_v47 = vsel %vm1780_vm10, %v1782_v46, %v1778_v61  ;;  %v3620_v13 = vadd.f32 1.0, %v2251_v35  ;;  %v1794_v26 = vand.u32 2147483647, %v3529_v50  ;;  %v3624_v51 = vpop.eup %2252  ;;  %v1694_v22 = vadd.f32 %v1686_v54, %v1666_v9  ;;  %v1677_v46 = vld [vmem:[#allocation3 + $0x28] sm:$0xff] }
 0x477   :  { %v1868_v21 = vmul.f32 %v1860_v11, %v1692_v49  ;;  %v1869_v17 = vmul.f32 %v1861_v44, %v1693_v63  ;;  %v1802_v56 = vsub.f32 1.0, %v1801_v62  ;;  %v1862_v24 = vmul.f32 %v1783_v47, %v3478_v38  ;;  %v1667_v38 = vld [vmem:[#allocation5 + $0x18] sm:$0xff] }
 0x478   :  { %2256 = vrcp.f32 %v3620_v13  ;;  %v1793_v50 = vsel %vm3626_vm7, %v3560_v39, %v1789_v33  ;;  %vm1795_vm8 = vcmp.eq.f32.partialorder %v1794_v26, 8.507059e+37  ;;  %v1816_v6 = vmul.f32 %v3624_v51, %v3592_v10  ;;  %v1905_v26 = vld [vmem:[%s3756_s0 + $0x68] sm:$0xff] }
 0x479   :  { %1964 = vmatmul.f32.vlgmr.msra.gmra.mxu3 %v1868_v21  ;;  %v1803_v48 = vmul.f32 %v3595_v43, %v1802_v56  ;;  %v1870_v49 = vmul.f32 %v1862_v24, %v1694_v22  ;;  %vm1806_vm14 = vweird.f32 %v3595_v43  ;;  %v1798_v25 = vsel %vm1795_vm8, %v1797_v15, %v1793_v50  ;;  %v2255_v40 = vpop.eup %2254  ;;  %1926 = vrot.lane.b32.xlu2 %v1905_v26, %s2312_s12  ;;  %v1670_v50 = vld [vmem:[#allocation5 + $0x30] sm:$0xff] }
 0x47a   :  { %v1817_v29 = vsub.f32 1.0, %v1816_v6  ;;  %vm3646_vm15 = vmor %vm1805_vm13, %vm1806_vm14  ;;  %v3650_v57 = vadd.f32 1.0, %v2255_v40  ;;  %v1695_v30 = vadd.f32 %v1687_v32, %v1667_v38  ;;  %v1863_v58 = vmul.f32 %v1798_v25, %v3480_v55  ;;  %v1668_v55 = vld [vmem:[#allocation5 + $0x20] sm:$0xff]  ;;  %v1679_v25 = vld [vmem:[#allocation3 + $0x38] sm:$0xff] }
 0x47b   :  { %v1804_v39 = vadd.f32 %v3595_v43, %v1803_v48  ;;  %v1812_v18 = vor.u32 1.1754944e-38, %v1811_v16  ;;  %vm1810_vm1 = vcmp.eq.f32.partialorder %v1809_v20, 8.507059e+37  ;;  %vm1820_vm2 = vweird.f32 %v3592_v10 }
 0x47c   :  { %2258 = vrcp.f32 %v3650_v57  ;;  %v1818_v11 = vmul.f32 %v3624_v51, %v1817_v29  ;;  %v1871_v7 = vmul.f32 %v1863_v58, %v1695_v30  ;;  %vm1821_vm3 = vweird.f32 %v3624_v51  ;;  %v1671_v29 = vld [vmem:[#allocation5 + $0x38] sm:$0xff] }
 0x47d   :  { %v1808_v19 = vsel %vm3646_vm15, %v3595_v43, %v1804_v39  ;;  %v1826_v41 = vand.u32 2147483648, %v3592_v10  ;;  %v1824_v53 = vand.u32 2147483647, %v3592_v10  ;;  %vm3666_vm4 = vmor %vm1820_vm2, %vm1821_vm3  ;;  %v1696_v63 = vadd.f32 %v1688_v60, %v1668_v55  ;;  %v1907_v10 = vld [vmem:[%s3756_s0 + $0x78] sm:$0xff]  ;;  %v1894_v55 = vld [vmem:[%s3756_s0 + $0x10] sm:$0xff] }
 0x47e   :  { %v3644_v14 = vpop.eup %2256  ;;  %v1813_v12 = vsel %vm1810_vm1, %v1812_v18, %v1808_v19  ;;  %v1819_v21 = vadd.f32 %v3624_v51, %v1818_v11  ;;  %1930 = vrot.lane.b32.xlu1 %v1907_v10, %s2312_s12  ;;  %v1689_v35 = vmul.f32 %v3527_v31, %v1677_v46  ;;  %vm1835_vm9 = vweird.f32 %v3620_v13  ;;  %v1893_v11 = vld [vmem:[%s3756_s0 + $0x8] sm:$0xff] }
 0x47f   :  { %v1831_v8 = vmul.f32 %v3644_v14, %v3620_v13  ;;  %v1864_v44 = vmul.f32 %v1813_v12, %v3488_v23  ;;  %v1827_v61 = vor.u32 1.1754944e-38, %v1826_v41  ;;  %vm1825_vm6 = vcmp.eq.f32.partialorder %v1824_v53, 8.507059e+37 }
 0x480   :  { %v1823_v23 = vsel %vm3666_vm4, %v3624_v51, %v1819_v21  ;;  %vm1836_vm10 = vweird.f32 %v3644_v14  ;;  %v1841_v9 = vand.u32 2147483648, %v3620_v13  ;;  %v1839_v4 = vand.u32 2147483647, %v3620_v13 }
 0x481   :  { %1967 = vmatmul.f32.gmra.mxu3 %v1869_v17  ;;  %v1832_v28 = vsub.f32 1.0, %v1831_v8  ;;  %v1872_v54 = vmul.f32 %v1864_v44, %v1696_v63  ;;  %v1669_v17 = vld [vmem:[#allocation5 + $0x28] sm:$0xff]  ;;  %v1828_v27 = vsel %vm1825_vm6, %v1827_v61, %v1823_v23  ;;  %vm3697_vm11 = vmor %vm1835_vm9, %vm1836_vm10  ;;  %v1690_v15 = vmul.f32 %v3527_v31, %v1678_v3 }
 0x482   :  { %v2259_v43 = vpop.eup %2258  ;;  %v1697_v36 = vadd.f32 %v1689_v35, %v1669_v17  ;;  %v1865_v51 = vmul.f32 %v1828_v27, %v3503_v42  ;;  %v1842_v22 = vor.u32 1.1754944e-38, %v1841_v9  ;;  %vm1840_vm12 = vcmp.eq.f32.partialorder %v1839_v4, 8.507059e+37  ;;  %v1897_v23 = vld [vmem:[%s3756_s0 + $0x28] sm:$0xff]  ;;  %v1898_v17 = vld [vmem:[%s3756_s0 + $0x30] sm:$0xff] }
 0x483   :  { %v1833_v1 = vmul.f32 %v3644_v14, %v1832_v28  ;;  %v1846_v62 = vmul.f32 %v2259_v43, %v3650_v57  ;;  %vm1850_vm7 = vweird.f32 %v3650_v57  ;;  %vm1851_vm8 = vweird.f32 %v2259_v43  ;;  %v1895_v28 = vld [vmem:[%s3756_s0 + $0x18] sm:$0xff] }
 0x484   :  { %v1873_v34 = vmul.f32 %v1865_v51, %v1697_v36  ;;  %v1856_v42 = vand.u32 2147483648, %v3650_v57  ;;  %vm1852_vm13 = vmor %vm1850_vm7, %vm1851_vm8  ;;  %v1698_v32 = vadd.f32 %v1690_v15, %v1670_v50  ;;  %v1691_v20 = vmul.f32 %v3527_v31, %v1679_v25 }
 0x485   :  { %v1834_v47 = vadd.f32 %v3644_v14, %v1833_v1  ;;  %v1847_v33 = vsub.f32 1.0, %v1846_v62 }
 0x486   :  { %v1857_v16 = vor.u32 1.1754944e-38, %v1856_v42  ;;  %v1699_v52 = vadd.f32 %v1691_v20, %v1671_v29 }
 0x487   :  { %v1838_v13 = vsel %vm3697_vm11, %v3644_v14, %v1834_v47  ;;  %v1848_v24 = vmul.f32 %v2259_v43, %v1847_v33  ;;  %v1899_v33 = vld [vmem:[%s3756_s0 + $0x38] sm:$0xff] }
 0x488   :  { %v1843_v48 = vsel %vm1840_vm12, %v1842_v22, %v1838_v13 }
 0x489   :  { %1970 = vmatmul.f32.gmra.mxu3 %v1870_v49  ;;  %v1849_v6 = vadd.f32 %v2259_v43, %v1848_v24  ;;  %v1854_v49 = vand.u32 2147483647, %v3650_v57  ;;  %v1866_v38 = vmul.f32 %v1843_v48, %v3548_v2  ;;  %v1892_v2 = vld [vmem:[%s3756_s0] sm:$0xff] }
 0x48b   :  { %v1853_v40 = vsel %vm1852_vm13, %v2259_v43, %v1849_v6  ;;  %vm1855_vm14 = vcmp.eq.f32.partialorder %v1854_v49, 8.507059e+37  ;;  %v1874_v39 = vmul.f32 %v1866_v38, %v1698_v32 }
 0x48c   :  { %v1858_v14 = vsel %vm1855_vm14, %v1857_v16, %v1853_v40 }
 0x48d   :  { %v1867_v30 = vmul.f32 %v1858_v14, %v3607_v5 }
 0x48f   :  { %v1875_v58 = vmul.f32 %v1867_v30, %v1699_v52 }
 0x491   :  { %1973 = vmatmul.f32.gmra.mxu3 %v1871_v7 }
 0x499   :  { %1976 = vmatmul.f32.gmra.mxu3 %v1872_v54 }
 0x4a1   :  { %1979 = vmatmul.f32.gmra.mxu3 %v1873_v34 }
 0x4a9   :  { %1982 = vmatmul.f32.gmra.mxu3 %v1874_v39 }
 0x4b1   :  { %1985 = vmatmul.f32.gmra.mxu3 %v1875_v58 }
 0x4bb   :  { %v1921_v60 = vpop.permute.xlu1 %1920 }
 0x4bc   :  { %v1942_v12 = vsel %vm65_vm0, %v1894_v55, %v1921_v60 }
 0x4c4   :  { %v1917_v57 = vpop.permute.xlu0 %1916 }
 0x4c5   :  { %v1940_v37 = vsel %vm65_vm0, %v1892_v2, %v1917_v57 }
 0x4c9   :  { %v1925_v44 = vpop.permute.xlu2 %1924 }
 0x4ca   :  { %v1944_v45 = vsel %vm65_vm0, %v1896_v59, %v1925_v44 }
 0x4d0   :  { %v1919_v31 = vpop.permute.xlu0 %1918 }
 0x4d1   :  { %v1941_v5 = vsel %vm65_vm0, %v1893_v11, %v1919_v31 }
 0x4d3   :  { %v1927_v61 = vpop.permute.xlu2 %1926 }
 0x4d4   :  { %v1945_v1 = vsel %vm65_vm0, %v1897_v23, %v1927_v61 }
 0x4e0   :  { %v1923_v53 = vpop.permute.xlu1 %1922 }
 0x4e1   :  { %v1943_v43 = vsel %vm65_vm0, %v1895_v28, %v1923_v53 }
 0x4e3   :  { %v1929_v35 = vpop.permute.xlu0 %1928 }
 0x4e4   :  { %v1946_v27 = vsel %vm65_vm0, %v1898_v17, %v1929_v35 }
 0x4f0   :  { %v1931_v4 = vpop.permute.xlu1 %1930 }
 0x4f1   :  { %v1947_v26 = vsel %vm65_vm0, %v1899_v33, %v1931_v4 }
 0x4fc   :  { %v1965_v18 = vpop.f32.mrf.mxu3 }
 0x4fd   :  { %v1966_v19 = vadd.f32 %v1965_v18, %v1940_v37 }
 0x4ff   :  { %1989 = vst.msk [vmem:[#allocation6] sm:$0xff] %vm478_vm5, %v1966_v19 }
 0x504   :  { %v1968_v8 = vpop.f32.mrf.mxu3 }
 0x505   :  { %v1969_v7 = vadd.f32 %v1968_v8, %v1941_v5 }
 0x507   :  { %1990 = vst.msk [vmem:[#allocation6 + $0x8] sm:$0xff] %vm478_vm5, %v1969_v7 }
 0x50c   :  { %v1971_v41 = vpop.f32.mrf.mxu3 }
 0x50d   :  { %v1972_v21 = vadd.f32 %v1971_v41, %v1942_v12 }
 0x50f   :  { %1991 = vst.msk [vmem:[#allocation6 + $0x10] sm:$0xff] %vm478_vm5, %v1972_v21 }
 0x514   :  { %v1974_v0 = vpop.f32.mrf.mxu3 }
 0x515   :  { %v1975_v63 = vadd.f32 %v1974_v0, %v1943_v43 }
 0x517   :  { %1992 = vst.msk [vmem:[#allocation6 + $0x18] sm:$0xff] %vm478_vm5, %v1975_v63 }
 0x51c   :  { %v1977_v10 = vpop.f32.mrf.mxu3 }
 0x51d   :  { %v1978_v46 = vadd.f32 %v1977_v10, %v1944_v45 }
 0x51f   :  { %1993 = vst.msk [vmem:[#allocation6 + $0x20] sm:$0xff] %vm478_vm5, %v1978_v46 }
 0x524   :  { %v1980_v62 = vpop.f32.mrf.mxu3 }
 0x525   :  { %v1981_v54 = vadd.f32 %v1980_v62, %v1945_v1 }
 0x527   :  { %1994 = vst.msk [vmem:[#allocation6 + $0x28] sm:$0xff] %vm478_vm5, %v1981_v54 }
 0x52c   :  { %v1983_v9 = vpop.f32.mrf.mxu3 }
 0x52d   :  { %v1984_v47 = vadd.f32 %v1983_v9, %v1946_v27 }
 0x52f   :  { %1995 = vst.msk [vmem:[#allocation6 + $0x30] sm:$0xff] %vm478_vm5, %v1984_v47 }
 0x534   :  { %v1986_v56 = vpop.f32.mrf.mxu3 }
 0x535   :  { %v1987_v36 = vadd.f32 %v1986_v56, %v1947_v26 }
 0x537   :  { %1996 = vst.msk [vmem:[#allocation6 + $0x38] sm:$0xff] %vm478_vm5, %v1987_v36 }
 0x538   :  { %2009 = dma.vmem_to_hbm [thread:$0]  %s2002_s8, 1024, %s2004_s27, [#allocation7], %s2314_s4, %s2314_s4, %s2315_s1  }
 0x539   :  { %2296 = dma.done.wait [#allocation7], 1024  }
 0x53a   :  { %2297 = vsyncadd [#allocation7], 4294966272 }
 0x53b   :  { %2014 = vsyncpa [#allocation7], 1 }

</bundles_post_ra>
